<compile_context>
chip_gen: v7x
topology: tpu7x:2x2x1
jax: 0.10.0
libtpu: 0.0.40
codegen_flags: <defaults>
</compile_context>

<pallas_src>
import functools
import math

import jax
import jax.numpy as jnp
from jax.experimental import pallas as pl
from jax.experimental.pallas import tpu as pltpu


# ----------------------------------------------------------------------------
# Mask construction (glue: plain JAX, mirrors the torch get_grid / get_mask)
# ----------------------------------------------------------------------------
def _get_grid(H, W):
    x = jnp.linspace(-(H // 2 - 1) * jnp.pi / (H // 2), jnp.pi, H)
    x = jnp.broadcast_to(x.reshape(H, 1), (H, W))
    y = jnp.linspace(-(W // 2 - 1) * jnp.pi / (W // 2), jnp.pi, W)
    y = jnp.broadcast_to(y.reshape(1, W), (H, W))
    radius = jnp.sqrt(x ** 2 + y ** 2)
    theta = jnp.arctan(y / x)
    theta = theta + jnp.where(x < 0, jnp.pi, 0.0)
    theta = theta + jnp.where((x >= 0) & (y < 0), 2.0 * jnp.pi, 0.0)
    return radius, theta


def _get_band_filters(K, H, W, is_complex=True):
    radius, theta = _get_grid(H, W)
    alpha_k = (2 ** (K - 1)) * math.factorial(K - 1) / math.sqrt(
        K * math.factorial(2 * (K - 1)))
    bands = []
    for k in range(K):
        if is_complex:
            band_k = 2.0 * jnp.abs(
                alpha_k * jnp.power(
                    jax.nn.relu(jnp.cos(theta - jnp.pi * k / K)), K - 1))
            band_k = jnp.where(radius > jnp.pi, 0.0, band_k)
            band_k = jnp.where(radius < jnp.pi / 32, 0.0, band_k)
        else:
            band_k = jnp.abs(
                alpha_k * jnp.power(jnp.cos(theta - jnp.pi * k / K), K - 1))
        band_k = band_k.at[H // 2 - 1, W // 2 - 1].set(0.0)
        bands.append(band_k)
    return jnp.stack(bands, axis=0).astype(jnp.float32)  # (K, H, W)


# ----------------------------------------------------------------------------
# Precompute: dense per-band complex decomposition operators
# ----------------------------------------------------------------------------
def _build_operators(K, H, W):
    """Returns (W_real, W_imag), each (H*W, K*H*W) float32.

    Row index = flattened input pixel (row-major h*W+w), column index
    k*H*W + (h*W + w) = output pixel of band k, so that
        out_k = x_row @ W[:, k*HW:(k+1)*HW]
    reproduces ifft2(ifftshift(fftshift(fft2(x)) * band_k)).
    """
    HW = H * W
    band = _get_band_filters(K, H, W, is_complex=True)            # (K, H, W)
    # Fold fftshift/ifftshift into the mask (work in un-shifted Fourier space)
    m = jnp.fft.ifftshift(band, axes=(1, 2)).reshape(K, HW).astype(jnp.complex64)

    jH = jnp.arange(H, dtype=jnp.float32)
    jW = jnp.arange(W, dtype=jnp.float32)
    FH = jnp.exp(-2j * jnp.pi * (jH[:, None] * jH[None, :]) / H)
    FW = jnp.exp(-2j * jnp.pi * (jW[:, None] * jW[None, :]) / W)
    G = jnp.kron(FH, FW).astype(jnp.complex64)                    # (HW, HW)

    # W_k = (1/HW) * G @ diag(m_k) @ conj(G)   (G symmetric, so this is the
    # transpose of the column-vector operator, matching x_row @ W_k).
    Wk = jnp.einsum('ij,kj,jl->kil', G, m, jnp.conj(G),
                    precision=jax.lax.Precision.HIGHEST) / HW     # (K, HW, HW)
    Wr = jnp.transpose(jnp.real(Wk), (1, 0, 2)).reshape(HW, K * HW)
    Wi = jnp.transpose(jnp.imag(Wk), (1, 0, 2)).reshape(HW, K * HW)
    return Wr.astype(jnp.float32), Wi.astype(jnp.float32)


# ----------------------------------------------------------------------------
# Pallas kernel: one lane-dense GEMM per grid step (TB batched images)
# ----------------------------------------------------------------------------
def _steerable_gemm_kernel(x_ref, wr_ref, wi_ref, out_r_ref, out_i_ref):
    x = x_ref[...]                                    # (TB, HW) f32
    out_r_ref[...] = jnp.dot(x, wr_ref[...],
                             preferred_element_type=jnp.float32)
    out_i_ref[...] = jnp.dot(x, wi_ref[...],
                             preferred_element_type=jnp.float32)


@functools.partial(jax.jit, static_argnames=("K",))
def steerable_decomp(x, K=4):
    """x: (B, C, H, W) float32 -> (B, C, K, H, W) complex64."""
    B, C, H, W = x.shape
    HW = H * W
    KHW = K * HW
    BC = B * C

    # TODO(synk): the dense (HW, K*HW) operator is only practical for small
    # images (H*W <~ 1024); larger images should fall back to a factored
    # DFT-matrix kernel with batched/band-stacked matmuls.
    Wr, Wi = _build_operators(K, H, W)

    # Batch TB images per grid step (sublane multiple of 8); pad BC if needed.
    TB = 8
    while TB < 64 and TB < BC:
        TB *= 2
    BC_pad = ((BC + TB - 1) // TB) * TB

    xf = x.reshape(BC, HW).astype(jnp.float32)
    if BC_pad != BC:
        xf = jnp.pad(xf, ((0, BC_pad - BC), (0, 0)))

    out_r, out_i = pl.pallas_call(
        _steerable_gemm_kernel,
        out_shape=(
            jax.ShapeDtypeStruct((BC_pad, KHW), jnp.float32),
            jax.ShapeDtypeStruct((BC_pad, KHW), jnp.float32),
        ),
        grid_spec=pltpu.PrefetchScalarGridSpec(
            num_scalar_prefetch=0,
            grid=(BC_pad // TB,),
            in_specs=[
                pl.BlockSpec((TB, HW), lambda i: (i, 0)),     # images
                pl.BlockSpec((HW, KHW), lambda i: (0, 0)),    # real operator
                pl.BlockSpec((HW, KHW), lambda i: (0, 0)),    # imag operator
            ],
            out_specs=[
                pl.BlockSpec((TB, KHW), lambda i: (i, 0)),
                pl.BlockSpec((TB, KHW), lambda i: (i, 0)),
            ],
        ),
        compiler_params=pltpu.CompilerParams(
            dimension_semantics=("parallel",)),
    )(xf, Wr, Wi)

    out_r = out_r[:BC].reshape(B, C, K, H, W)
    out_i = out_i[:BC].reshape(B, C, K, H, W)
    return jax.lax.complex(out_r, out_i).astype(jnp.complex64)


# ----------------------------------------------------------------------------
# Pure-JAX reference (same semantics as the torch forward)
# ----------------------------------------------------------------------------
def steerable_decomp_ref(x, K=4):
    band_filters = _get_band_filters(K, x.shape[2], x.shape[3], True)
    fourier = jnp.fft.fftshift(jnp.fft.fft2(x), axes=(2, 3))
    band_signal = fourier[:, :, None, :, :] * band_filters
    return jnp.fft.ifft2(jnp.fft.ifftshift(band_signal, axes=(3, 4)))


if __name__ == "__main__":
    key = jax.random.PRNGKey(0)
    B, C, H, W, K = 2, 4, 16, 16, 4
    x = jax.random.normal(key, (B, C, H, W), dtype=jnp.float32)

    out = steerable_decomp(x, K=K)
    out = jax.block_until_ready(out)

    ref = jax.block_until_ready(steerable_decomp_ref(x, K=K))
    assert out.shape == (B, C, K, H, W), out.shape
    assert out.dtype == jnp.complex64, out.dtype
    assert jnp.allclose(out.real, ref.real, atol=2e-3, rtol=1e-3)
    assert jnp.allclose(out.imag, ref.imag, atol=2e-3, rtol=1e-3)

    print("KERNEL_OK")
</pallas_src>

<mosaic_0001>
module attributes {stable_mosaic.version = 11 : i64} {
  func.func @_steerable_gemm_kernel(%arg0: i32, %arg1: memref<8x256xf32, #tpu.memory_space<vmem>>, %arg2: memref<256x1024xf32, #tpu.memory_space<vmem>>, %arg3: memref<256x1024xf32, #tpu.memory_space<vmem>>, %arg4: memref<8x1024xf32, #tpu.memory_space<vmem>>, %arg5: memref<8x1024xf32, #tpu.memory_space<vmem>>) attributes {dimension_semantics = [#tpu.dimension_semantics<parallel>], iteration_bounds = array<i64: 1>, scalar_prefetch = 0 : i64, scratch_operands = 0 : i64, tpu.core_type = #tpu.core_type<tc>, window_params = [{transform_indices = @transform_0, window_bounds = array<i64: 8, 256>}, {pipeline_mode = #tpu.pipeline_mode<synchronous>, transform_indices = @transform_1, window_bounds = array<i64: 256, 1024>}, {pipeline_mode = #tpu.pipeline_mode<synchronous>, transform_indices = @transform_2, window_bounds = array<i64: 256, 1024>}, {transform_indices = @transform_3, window_bounds = array<i64: 8, 1024>}, {transform_indices = @transform_4, window_bounds = array<i64: 8, 1024>}]} {
    %c0 = arith.constant 0 : index
    %c0_0 = arith.constant 0 : index
    %0 = vector.load %arg1[%c0, %c0_0] : memref<8x256xf32, #tpu.memory_space<vmem>>, vector<8x256xf32>
    %c0_1 = arith.constant 0 : index
    %c0_2 = arith.constant 0 : index
    %1 = vector.load %arg2[%c0_1, %c0_2] : memref<256x1024xf32, #tpu.memory_space<vmem>>, vector<256x1024xf32>
    %cst = arith.constant dense<0.000000e+00> : vector<8x1024xf32>
    %2 = tpu.matmul %0, %1, %cst {dimension_numbers = #tpu.dot_dimension_numbers<[1], [0], [0], [1], [0, 0, 1, 1], [], []>} : vector<8x256xf32>, vector<256x1024xf32>, vector<8x1024xf32> -> vector<8x1024xf32>
    %c0_3 = arith.constant 0 : index
    %c0_4 = arith.constant 0 : index
    %3 = vector.load %arg4[%c0_3, %c0_4] : memref<8x1024xf32, #tpu.memory_space<vmem>>, vector<8x1024xf32>
    tpu.vector_store %arg4[%c0_3, %c0_4], %2 {strides = array<i32>} : memref<8x1024xf32, #tpu.memory_space<vmem>>, vector<8x1024xf32>,
    %c0_5 = arith.constant 0 : index
    %c0_6 = arith.constant 0 : index
    %4 = vector.load %arg3[%c0_5, %c0_6] : memref<256x1024xf32, #tpu.memory_space<vmem>>, vector<256x1024xf32>
    %cst_7 = arith.constant dense<0.000000e+00> : vector<8x1024xf32>
    %5 = tpu.matmul %0, %4, %cst_7 {dimension_numbers = #tpu.dot_dimension_numbers<[1], [0], [0], [1], [0, 0, 1, 1], [], []>} : vector<8x256xf32>, vector<256x1024xf32>, vector<8x1024xf32> -> vector<8x1024xf32>
    %c0_8 = arith.constant 0 : index
    %c0_9 = arith.constant 0 : index
    %6 = vector.load %arg5[%c0_8, %c0_9] : memref<8x1024xf32, #tpu.memory_space<vmem>>, vector<8x1024xf32>
    tpu.vector_store %arg5[%c0_8, %c0_9], %5 {strides = array<i32>} : memref<8x1024xf32, #tpu.memory_space<vmem>>, vector<8x1024xf32>,
    return
  }
  func.func @transform_0(%arg0: i32) -> (i32, i32) {
    %c0_i32 = arith.constant 0 : i32
    %c0_i32_0 = arith.constant 0 : i32
    return %arg0, %c0_i32 : i32, i32
  }
  func.func @transform_1(%arg0: i32) -> (i32, i32) {
    %c0_i32 = arith.constant 0 : i32
    %c0_i32_0 = arith.constant 0 : i32
    %c0_i32_1 = arith.constant 0 : i32
    return %c0_i32, %c0_i32_0 : i32, i32
  }
  func.func @transform_2(%arg0: i32) -> (i32, i32) {
    %c0_i32 = arith.constant 0 : i32
    %c0_i32_0 = arith.constant 0 : i32
    %c0_i32_1 = arith.constant 0 : i32
    return %c0_i32, %c0_i32_0 : i32, i32
  }
  func.func @transform_3(%arg0: i32) -> (i32, i32) {
    %c0_i32 = arith.constant 0 : i32
    %c0_i32_0 = arith.constant 0 : i32
    return %arg0, %c0_i32 : i32, i32
  }
  func.func @transform_4(%arg0: i32) -> (i32, i32) {
    %c0_i32 = arith.constant 0 : i32
    %c0_i32_0 = arith.constant 0 : i32
    return %arg0, %c0_i32 : i32, i32
  }
}

</mosaic_0001>

<bundles_post_ra>
// kernel: integer_pow.0
= control target key start
LH: loop header
LB: loop body
LE: loop exit
PB: predicated region body
PF: predicated region fallthrough
CT: control target
= control target key end

     0   :  { %s34_s0 = inlined_call_operand.vmem [shape: f32[16], index: 0, kind: input, shape index: {}, may-alias: {0,1}]   ;;  %s35_s1 = inlined_call_operand.vmem [shape: f32[16], index: 1, kind: input, shape index: {}, may-alias: {0,1}]   ;;  %s36_s2 = inlined_call_operand.vmem [shape: f32[16], index: 2, kind: output, shape index: {}]  }
   0x1   :  { %v3_v0 = vld [vmem:[%s34_s0] sm:$0x1] }
   0x2   :  { %v4_v1 = vld [vmem:[%s35_s1] sm:$0x1] }
   0x3   :  { %v7_v2 = vmul.f32 %v4_v1, %v3_v0 }
   0x5   :  { %9 = vst [vmem:[%s36_s2] sm:$0x1] %v7_v2 }

// kernel: steerable_decomp.1
= control target key start
LH: loop header
LB: loop body
LE: loop exit
PB: predicated region body
PF: predicated region fallthrough
CT: control target
= control target key end

     0   :  { %s3277_s1 = inlined_call_operand.vmem [shape: f32[256,1024], index: 1, kind: input, shape index: {}]   ;;  %s3278_s0 = inlined_call_operand.vmem [shape: f32[8,256], index: 0, kind: input, shape index: {}]   ;;  %s3279_s2 = inlined_call_operand.vmem [shape: f32[256,1024], index: 2, kind: input, shape index: {}]   ;;  %s3280_s3 = inlined_call_operand.vmem [shape: f32[8,1024], index: 3, kind: output, shape index: {0}]   ;;  %s3281_s4 = inlined_call_operand.vmem [shape: f32[8,1024], index: 4, kind: output, shape index: {1}]  }
   0x1   :  { %v19_v0 = vld [vmem:[%s3277_s1 + $0x8] sm:$0xff]  ;;  %v21_v2 = vld [vmem:[%s3277_s1 + $0x18] sm:$0xff]  ;;  %v18_v5 = vld [vmem:[%s3277_s1] sm:$0xff] }
   0x2   :  { %v27_v1 = vld [vmem:[%s3277_s1 + $0x48] sm:$0xff]  ;;  %v29_v4 = vld [vmem:[%s3277_s1 + $0x58] sm:$0xff]  ;;  %v26_v6 = vld [vmem:[%s3277_s1 + $0x40] sm:$0xff] }
   0x3   :  { %v1122_v3 = vpack.c.bf16 %v27_v1, %v19_v0  ;;  %v1186_v7 = vpack.c.bf16 %v29_v4, %v21_v2  ;;  %v1124_v8 = vpack.c.bf16 %v26_v6, %v18_v5  ;;  %v20_v9 = vld [vmem:[%s3277_s1 + $0x10] sm:$0xff]  ;;  %v35_v11 = vld [vmem:[%s3277_s1 + $0x88] sm:$0xff]  ;;  %v37_v14 = vld [vmem:[%s3277_s1 + $0x98] sm:$0xff] }
   0x4   :  { %v28_v10 = vld [vmem:[%s3277_s1 + $0x50] sm:$0xff]  ;;  %v43_v13 = vld [vmem:[%s3277_s1 + $0xc8] sm:$0xff]  ;;  %v45_v15 = vld [vmem:[%s3277_s1 + $0xd8] sm:$0xff] }
   0x5   :  { %1123 = vmatprep.subr.bf16.mxu0 %v1122_v3  ;;  %v1188_v12 = vpack.c.bf16 %v28_v10, %v20_v9  ;;  %1187 = vmatprep.subr.bf16.mxu1 %v1186_v7  ;;  %v1126_v16 = vpack.c.bf16 %v43_v13, %v35_v11  ;;  %v1190_v17 = vpack.c.bf16 %v45_v15, %v37_v14  ;;  %v34_v18 = vld [vmem:[%s3277_s1 + $0x80] sm:$0xff]  ;;  %v36_v20 = vld [vmem:[%s3277_s1 + $0x90] sm:$0xff]  ;;  %v51_v23 = vld [vmem:[%s3277_s1 + $0x108] sm:$0xff] }
   0x6   :  { %1125 = vmatpush1.bf16.msra.mxu0 %v1124_v8  ;;  %v42_v19 = vld [vmem:[%s3277_s1 + $0xc0] sm:$0xff]  ;;  %v44_v22 = vld [vmem:[%s3277_s1 + $0xd0] sm:$0xff]  ;;  %v59_v24 = vld [vmem:[%s3277_s1 + $0x148] sm:$0xff] }
   0x7   :  { %1189 = vmatpush1.bf16.msra.mxu1 %v1188_v12  ;;  %v1128_v21 = vpack.c.bf16 %v42_v19, %v34_v18  ;;  %1127 = vmatprep.subr.bf16.mxu0 %v1126_v16  ;;  %v1192_v25 = vpack.c.bf16 %v44_v22, %v36_v20  ;;  %v1130_v26 = vpack.c.bf16 %v59_v24, %v51_v23  ;;  %v53_v27 = vld [vmem:[%s3277_s1 + $0x118] sm:$0xff]  ;;  %v50_v29 = vld [vmem:[%s3277_s1 + $0x100] sm:$0xff]  ;;  %v52_v32 = vld [vmem:[%s3277_s1 + $0x110] sm:$0xff] }
   0x8   :  { %1191 = vmatprep.subr.bf16.mxu1 %v1190_v17  ;;  %v61_v28 = vld [vmem:[%s3277_s1 + $0x158] sm:$0xff]  ;;  %v58_v31 = vld [vmem:[%s3277_s1 + $0x140] sm:$0xff]  ;;  %v60_v33 = vld [vmem:[%s3277_s1 + $0x150] sm:$0xff] }
   0x9   :  { %v1194_v30 = vpack.c.bf16 %v61_v28, %v53_v27  ;;  %v1132_v34 = vpack.c.bf16 %v58_v31, %v50_v29  ;;  %v67_v35 = vld [vmem:[%s3277_s1 + $0x188] sm:$0xff]  ;;  %v69_v37 = vld [vmem:[%s3277_s1 + $0x198] sm:$0xff]  ;;  %v1196_v38 = vpack.c.bf16 %v60_v33, %v52_v32  ;;  %v66_v41 = vld [vmem:[%s3277_s1 + $0x180] sm:$0xff] }
   0xa   :  { %1129 = vmatpush1.bf16.msra.mxu0 %v1128_v21  ;;  %v75_v36 = vld [vmem:[%s3277_s1 + $0x1c8] sm:$0xff]  ;;  %v77_v40 = vld [vmem:[%s3277_s1 + $0x1d8] sm:$0xff]  ;;  %v74_v42 = vld [vmem:[%s3277_s1 + $0x1c0] sm:$0xff] }
   0xb   :  { %1193 = vmatpush1.bf16.msra.mxu1 %v1192_v25  ;;  %1131 = vmatprep.subr.bf16.mxu0 %v1130_v26  ;;  %v1134_v39 = vpack.c.bf16 %v75_v36, %v67_v35  ;;  %v1198_v43 = vpack.c.bf16 %v77_v40, %v69_v37  ;;  %v68_v44 = vld [vmem:[%s3277_s1 + $0x190] sm:$0xff]  ;;  %v83_v46 = vld [vmem:[%s3277_s1 + $0x208] sm:$0xff]  ;;  %v85_v48 = vld [vmem:[%s3277_s1 + $0x218] sm:$0xff]  ;;  %v1136_v50 = vpack.c.bf16 %v74_v42, %v66_v41 }
   0xc   :  { %1195 = vmatprep.subr.bf16.mxu1 %v1194_v30  ;;  %v76_v45 = vld [vmem:[%s3277_s1 + $0x1d0] sm:$0xff]  ;;  %v91_v47 = vld [vmem:[%s3277_s1 + $0x248] sm:$0xff]  ;;  %v93_v49 = vld [vmem:[%s3277_s1 + $0x258] sm:$0xff] }
   0xd   :  { %v1200_v51 = vpack.c.bf16 %v76_v45, %v68_v44  ;;  %v1138_v52 = vpack.c.bf16 %v91_v47, %v83_v46  ;;  %v82_v53 = vld [vmem:[%s3277_s1 + $0x200] sm:$0xff]  ;;  %v84_v55 = vld [vmem:[%s3277_s1 + $0x210] sm:$0xff]  ;;  %v1202_v56 = vpack.c.bf16 %v93_v49, %v85_v48  ;;  %v99_v58 = vld [vmem:[%s3277_s1 + $0x288] sm:$0xff] }
   0xe   :  { %1133 = vmatpush1.bf16.msra.mxu0 %v1132_v34  ;;  %v90_v54 = vld [vmem:[%s3277_s1 + $0x240] sm:$0xff]  ;;  %v92_v57 = vld [vmem:[%s3277_s1 + $0x250] sm:$0xff]  ;;  %v107_v59 = vld [vmem:[%s3277_s1 + $0x2c8] sm:$0xff] }
   0xf   :  { %1197 = vmatpush1.bf16.msra.mxu1 %v1196_v38  ;;  %1135 = vmatprep.subr.bf16.mxu0 %v1134_v39  ;;  %v101_v60 = vld [vmem:[%s3277_s1 + $0x298] sm:$0xff]  ;;  %v1140_v62 = vpack.c.bf16 %v90_v54, %v82_v53  ;;  %v1204_v63 = vpack.c.bf16 %v92_v57, %v84_v55  ;;  %v1142_v0 = vpack.c.bf16 %v107_v59, %v99_v58  ;;  %v98_v1 = vld [vmem:[%s3277_s1 + $0x280] sm:$0xff]  ;;  %v100_v3 = vld [vmem:[%s3277_s1 + $0x290] sm:$0xff] }
  0x10   :  { %1199 = vmatprep.subr.bf16.mxu1 %v1198_v43  ;;  %v109_v61 = vld [vmem:[%s3277_s1 + $0x2d8] sm:$0xff]  ;;  %v106_v2 = vld [vmem:[%s3277_s1 + $0x2c0] sm:$0xff]  ;;  %v108_v5 = vld [vmem:[%s3277_s1 + $0x2d0] sm:$0xff] }
  0x11   :  { %v1206_v4 = vpack.c.bf16 %v109_v61, %v101_v60  ;;  %v115_v6 = vld [vmem:[%s3277_s1 + $0x308] sm:$0xff]  ;;  %v117_v8 = vld [vmem:[%s3277_s1 + $0x318] sm:$0xff]  ;;  %v1144_v10 = vpack.c.bf16 %v106_v2, %v98_v1  ;;  %v1208_v11 = vpack.c.bf16 %v108_v5, %v100_v3  ;;  %v114_v13 = vld [vmem:[%s3277_s1 + $0x300] sm:$0xff] }
  0x12   :  { %1137 = vmatpush1.bf16.msra.mxu0 %v1136_v50  ;;  %v123_v7 = vld [vmem:[%s3277_s1 + $0x348] sm:$0xff]  ;;  %v125_v9 = vld [vmem:[%s3277_s1 + $0x358] sm:$0xff]  ;;  %v122_v14 = vld [vmem:[%s3277_s1 + $0x340] sm:$0xff] }
  0x13   :  { %1201 = vmatpush1.bf16.msra.mxu1 %v1200_v51  ;;  %1139 = vmatprep.subr.bf16.mxu0 %v1138_v52  ;;  %v1146_v12 = vpack.c.bf16 %v123_v7, %v115_v6  ;;  %v116_v15 = vld [vmem:[%s3277_s1 + $0x310] sm:$0xff]  ;;  %v1210_v16 = vpack.c.bf16 %v125_v9, %v117_v8  ;;  %v131_v18 = vld [vmem:[%s3277_s1 + $0x388] sm:$0xff]  ;;  %v133_v20 = vld [vmem:[%s3277_s1 + $0x398] sm:$0xff]  ;;  %v1148_v22 = vpack.c.bf16 %v122_v14, %v114_v13 }
  0x14   :  { %1203 = vmatprep.subr.bf16.mxu1 %v1202_v56  ;;  %v124_v17 = vld [vmem:[%s3277_s1 + $0x350] sm:$0xff]  ;;  %v139_v19 = vld [vmem:[%s3277_s1 + $0x3c8] sm:$0xff]  ;;  %v141_v21 = vld [vmem:[%s3277_s1 + $0x3d8] sm:$0xff] }
  0x15   :  { %v1212_v23 = vpack.c.bf16 %v124_v17, %v116_v15  ;;  %v1150_v24 = vpack.c.bf16 %v139_v19, %v131_v18  ;;  %v130_v25 = vld [vmem:[%s3277_s1 + $0x380] sm:$0xff]  ;;  %v132_v27 = vld [vmem:[%s3277_s1 + $0x390] sm:$0xff]  ;;  %v1214_v28 = vpack.c.bf16 %v141_v21, %v133_v20  ;;  %v147_v30 = vld [vmem:[%s3277_s1 + $0x408] sm:$0xff] }
  0x16   :  { %1141 = vmatpush1.bf16.msra.mxu0 %v1140_v62  ;;  %v138_v26 = vld [vmem:[%s3277_s1 + $0x3c0] sm:$0xff]  ;;  %v140_v29 = vld [vmem:[%s3277_s1 + $0x3d0] sm:$0xff]  ;;  %v155_v31 = vld [vmem:[%s3277_s1 + $0x448] sm:$0xff] }
  0x17   :  { %1205 = vmatpush1.bf16.msra.mxu1 %v1204_v63  ;;  %1143 = vmatprep.subr.bf16.mxu0 %v1142_v0  ;;  %v149_v32 = vld [vmem:[%s3277_s1 + $0x418] sm:$0xff]  ;;  %v1152_v34 = vpack.c.bf16 %v138_v26, %v130_v25  ;;  %v1216_v35 = vpack.c.bf16 %v140_v29, %v132_v27  ;;  %v1154_v36 = vpack.c.bf16 %v155_v31, %v147_v30  ;;  %v146_v37 = vld [vmem:[%s3277_s1 + $0x400] sm:$0xff]  ;;  %v148_v39 = vld [vmem:[%s3277_s1 + $0x410] sm:$0xff] }
  0x18   :  { %1207 = vmatprep.subr.bf16.mxu1 %v1206_v4  ;;  %v157_v33 = vld [vmem:[%s3277_s1 + $0x458] sm:$0xff]  ;;  %v154_v38 = vld [vmem:[%s3277_s1 + $0x440] sm:$0xff]  ;;  %v156_v41 = vld [vmem:[%s3277_s1 + $0x450] sm:$0xff] }
  0x19   :  { %v1218_v40 = vpack.c.bf16 %v157_v33, %v149_v32  ;;  %v163_v42 = vld [vmem:[%s3277_s1 + $0x488] sm:$0xff]  ;;  %v165_v44 = vld [vmem:[%s3277_s1 + $0x498] sm:$0xff]  ;;  %v1156_v46 = vpack.c.bf16 %v154_v38, %v146_v37  ;;  %v1220_v47 = vpack.c.bf16 %v156_v41, %v148_v39  ;;  %v162_v49 = vld [vmem:[%s3277_s1 + $0x480] sm:$0xff] }
  0x1a   :  { %1145 = vmatpush1.bf16.msra.mxu0 %v1144_v10  ;;  %v171_v43 = vld [vmem:[%s3277_s1 + $0x4c8] sm:$0xff]  ;;  %v173_v45 = vld [vmem:[%s3277_s1 + $0x4d8] sm:$0xff]  ;;  %v170_v50 = vld [vmem:[%s3277_s1 + $0x4c0] sm:$0xff] }
  0x1b   :  { %1209 = vmatpush1.bf16.msra.mxu1 %v1208_v11  ;;  %1147 = vmatprep.subr.bf16.mxu0 %v1146_v12  ;;  %v1158_v48 = vpack.c.bf16 %v171_v43, %v163_v42  ;;  %v164_v51 = vld [vmem:[%s3277_s1 + $0x490] sm:$0xff]  ;;  %v1222_v52 = vpack.c.bf16 %v173_v45, %v165_v44  ;;  %v179_v54 = vld [vmem:[%s3277_s1 + $0x508] sm:$0xff]  ;;  %v181_v56 = vld [vmem:[%s3277_s1 + $0x518] sm:$0xff]  ;;  %v1160_v58 = vpack.c.bf16 %v170_v50, %v162_v49 }
  0x1c   :  { %1211 = vmatprep.subr.bf16.mxu1 %v1210_v16  ;;  %v172_v53 = vld [vmem:[%s3277_s1 + $0x4d0] sm:$0xff]  ;;  %v187_v55 = vld [vmem:[%s3277_s1 + $0x548] sm:$0xff]  ;;  %v189_v57 = vld [vmem:[%s3277_s1 + $0x558] sm:$0xff] }
  0x1d   :  { %v1224_v59 = vpack.c.bf16 %v172_v53, %v164_v51  ;;  %v1162_v60 = vpack.c.bf16 %v187_v55, %v179_v54  ;;  %v178_v61 = vld [vmem:[%s3277_s1 + $0x500] sm:$0xff]  ;;  %v180_v63 = vld [vmem:[%s3277_s1 + $0x510] sm:$0xff]  ;;  %v1226_v0 = vpack.c.bf16 %v189_v57, %v181_v56  ;;  %v195_v2 = vld [vmem:[%s3277_s1 + $0x588] sm:$0xff] }
  0x1e   :  { %1149 = vmatpush1.bf16.msra.mxu0 %v1148_v22  ;;  %v186_v62 = vld [vmem:[%s3277_s1 + $0x540] sm:$0xff]  ;;  %v188_v1 = vld [vmem:[%s3277_s1 + $0x550] sm:$0xff]  ;;  %v203_v3 = vld [vmem:[%s3277_s1 + $0x5c8] sm:$0xff] }
  0x1f   :  { %1213 = vmatpush1.bf16.msra.mxu1 %v1212_v23  ;;  %1151 = vmatprep.subr.bf16.mxu0 %v1150_v24  ;;  %v197_v4 = vld [vmem:[%s3277_s1 + $0x598] sm:$0xff]  ;;  %v1164_v6 = vpack.c.bf16 %v186_v62, %v178_v61  ;;  %v194_v7 = vld [vmem:[%s3277_s1 + $0x580] sm:$0xff]  ;;  %v1228_v8 = vpack.c.bf16 %v188_v1, %v180_v63  ;;  %v1166_v9 = vpack.c.bf16 %v203_v3, %v195_v2  ;;  %v196_v11 = vld [vmem:[%s3277_s1 + $0x590] sm:$0xff] }
  0x20   :  { %1215 = vmatprep.subr.bf16.mxu1 %v1214_v28  ;;  %v205_v5 = vld [vmem:[%s3277_s1 + $0x5d8] sm:$0xff]  ;;  %v202_v10 = vld [vmem:[%s3277_s1 + $0x5c0] sm:$0xff]  ;;  %v204_v12 = vld [vmem:[%s3277_s1 + $0x5d0] sm:$0xff] }
  0x21   :  { %v1230_v13 = vpack.c.bf16 %v205_v5, %v197_v4  ;;  %v211_v14 = vld [vmem:[%s3277_s1 + $0x608] sm:$0xff]  ;;  %v213_v17 = vld [vmem:[%s3277_s1 + $0x618] sm:$0xff]  ;;  %v1168_v19 = vpack.c.bf16 %v202_v10, %v194_v7  ;;  %v1232_v20 = vpack.c.bf16 %v204_v12, %v196_v11  ;;  %v210_v22 = vld [vmem:[%s3277_s1 + $0x600] sm:$0xff] }
  0x22   :  { %1153 = vmatpush1.bf16.msra.mxu0 %v1152_v34  ;;  %v219_v15 = vld [vmem:[%s3277_s1 + $0x648] sm:$0xff]  ;;  %v221_v18 = vld [vmem:[%s3277_s1 + $0x658] sm:$0xff]  ;;  %v218_v23 = vld [vmem:[%s3277_s1 + $0x640] sm:$0xff] }
  0x23   :  { %1217 = vmatpush1.bf16.msra.mxu1 %v1216_v35  ;;  %1155 = vmatprep.subr.bf16.mxu0 %v1154_v36  ;;  %v1958_v16 = vld [vmem:[%s3278_s0 + $0x8] sm:$0xff]  ;;  %v1170_v21 = vpack.c.bf16 %v219_v15, %v211_v14  ;;  %v212_v24 = vld [vmem:[%s3277_s1 + $0x610] sm:$0xff]  ;;  %v1234_v25 = vpack.c.bf16 %v221_v18, %v213_v17  ;;  %v229_v29 = vld [vmem:[%s3277_s1 + $0x698] sm:$0xff]  ;;  %v1172_v31 = vpack.c.bf16 %v218_v23, %v210_v22 }
  0x24   :  { %1219 = vmatprep.subr.bf16.mxu1 %v1218_v40  ;;  %338 = vmatprep.mubr.f32.mxu0 %v1958_v16  ;;  %v220_v26 = vld [vmem:[%s3277_s1 + $0x650] sm:$0xff]  ;;  %v227_v27 = vld [vmem:[%s3277_s1 + $0x688] sm:$0xff]  ;;  %v237_v30 = vld [vmem:[%s3277_s1 + $0x6d8] sm:$0xff] }
  0x25   :  { %409 = vmatprep.mubr.f32.mxu1 %v1958_v16  ;;  %v235_v28 = vld [vmem:[%s3277_s1 + $0x6c8] sm:$0xff]  ;;  %v1236_v32 = vpack.c.bf16 %v220_v26, %v212_v24  ;;  %v226_v34 = vld [vmem:[%s3277_s1 + $0x680] sm:$0xff]  ;;  %v228_v36 = vld [vmem:[%s3277_s1 + $0x690] sm:$0xff]  ;;  %v1238_v37 = vpack.c.bf16 %v237_v30, %v229_v29 }
  0x26   :  { %1157 = vmatpush1.bf16.msra.mxu0 %v1156_v46  ;;  %v1174_v33 = vpack.c.bf16 %v235_v28, %v227_v27  ;;  %v234_v35 = vld [vmem:[%s3277_s1 + $0x6c0] sm:$0xff]  ;;  %v236_v38 = vld [vmem:[%s3277_s1 + $0x6d0] sm:$0xff]  ;;  %v243_v39 = vld [vmem:[%s3277_s1 + $0x708] sm:$0xff] }
  0x27   :  { %1221 = vmatpush1.bf16.msra.mxu1 %v1220_v47  ;;  %1159 = vmatprep.subr.bf16.mxu0 %v1158_v48  ;;  %v251_v40 = vld [vmem:[%s3277_s1 + $0x748] sm:$0xff]  ;;  %v245_v41 = vld [vmem:[%s3277_s1 + $0x718] sm:$0xff]  ;;  %v1176_v43 = vpack.c.bf16 %v234_v35, %v226_v34  ;;  %v1240_v44 = vpack.c.bf16 %v236_v38, %v228_v36  ;;  %v242_v46 = vld [vmem:[%s3277_s1 + $0x700] sm:$0xff] }
  0x28   :  { %1223 = vmatprep.subr.bf16.mxu1 %v1222_v52  ;;  %v253_v42 = vld [vmem:[%s3277_s1 + $0x758] sm:$0xff]  ;;  %v1178_v45 = vpack.c.bf16 %v251_v40, %v243_v39  ;;  %v250_v47 = vld [vmem:[%s3277_s1 + $0x740] sm:$0xff]  ;;  %v244_v48 = vld [vmem:[%s3277_s1 + $0x710] sm:$0xff] }
  0x29   :  { %v1242_v49 = vpack.c.bf16 %v253_v42, %v245_v41  ;;  %v252_v50 = vld [vmem:[%s3277_s1 + $0x750] sm:$0xff]  ;;  %v259_v51 = vld [vmem:[%s3277_s1 + $0x788] sm:$0xff]  ;;  %v261_v53 = vld [vmem:[%s3277_s1 + $0x798] sm:$0xff]  ;;  %v1180_v55 = vpack.c.bf16 %v250_v47, %v242_v46 }
  0x2a   :  { %1161 = vmatpush1.bf16.msra.mxu0 %v1160_v58  ;;  %v267_v52 = vld [vmem:[%s3277_s1 + $0x7c8] sm:$0xff]  ;;  %v269_v54 = vld [vmem:[%s3277_s1 + $0x7d8] sm:$0xff]  ;;  %v1244_v56 = vpack.c.bf16 %v252_v50, %v244_v48  ;;  %v258_v58 = vld [vmem:[%s3277_s1 + $0x780] sm:$0xff] }
  0x2b   :  { %1225 = vmatpush1.bf16.msra.mxu1 %v1224_v59  ;;  %1163 = vmatprep.subr.bf16.mxu0 %v1162_v60  ;;  %v1182_v57 = vpack.c.bf16 %v267_v52, %v259_v51  ;;  %v266_v59 = vld [vmem:[%s3277_s1 + $0x7c0] sm:$0xff]  ;;  %v260_v60 = vld [vmem:[%s3277_s1 + $0x790] sm:$0xff]  ;;  %v1246_v61 = vpack.c.bf16 %v269_v54, %v261_v53  ;;  %v23_v63 = vld [vmem:[%s3277_s1 + $0x28] sm:$0xff] }
  0x2c   :  { %1227 = vmatprep.subr.bf16.mxu1 %v1226_v0  ;;  %v268_v62 = vld [vmem:[%s3277_s1 + $0x7d0] sm:$0xff]  ;;  %v31_v0 = vld [vmem:[%s3277_s1 + $0x68] sm:$0xff]  ;;  %v25_v1 = vld [vmem:[%s3277_s1 + $0x38] sm:$0xff]  ;;  %v1184_v3 = vpack.c.bf16 %v266_v59, %v258_v58 }
  0x2d   :  { %v33_v2 = vld [vmem:[%s3277_s1 + $0x78] sm:$0xff]  ;;  %v1248_v4 = vpack.c.bf16 %v268_v62, %v260_v60  ;;  %v1250_v5 = vpack.c.bf16 %v31_v0, %v23_v63  ;;  %v30_v7 = vld [vmem:[%s3277_s1 + $0x60] sm:$0xff]  ;;  %v32_v10 = vld [vmem:[%s3277_s1 + $0x70] sm:$0xff] }
  0x2e   :  { %1165 = vmatpush1.bf16.msra.mxu0 %v1164_v6  ;;  %v22_v6 = vld [vmem:[%s3277_s1 + $0x20] sm:$0xff]  ;;  %v39_v11 = vld [vmem:[%s3277_s1 + $0xa8] sm:$0xff]  ;;  %v49_v14 = vld [vmem:[%s3277_s1 + $0xf8] sm:$0xff] }
  0x2f   :  { %1229 = vmatpush1.bf16.msra.mxu1 %v1228_v8  ;;  %1167 = vmatprep.subr.bf16.mxu0 %v1166_v9  ;;  %v24_v8 = vld [vmem:[%s3277_s1 + $0x30] sm:$0xff]  ;;  %v1314_v9 = vpack.c.bf16 %v33_v2, %v25_v1  ;;  %v47_v12 = vld [vmem:[%s3277_s1 + $0xe8] sm:$0xff]  ;;  %v2091_v15 = vld [vmem:[%s3278_s0] sm:$0xff]  ;;  %v1252_v17 = vpack.c.bf16 %v30_v7, %v22_v6 }
  0x30   :  { %1231 = vmatprep.subr.bf16.mxu1 %v1230_v13  ;;  %v41_v13 = vld [vmem:[%s3277_s1 + $0xb8] sm:$0xff]  ;;  %v1316_v18 = vpack.c.bf16 %v32_v10, %v24_v8  ;;  %v40_v22 = vld [vmem:[%s3277_s1 + $0xb0] sm:$0xff]  ;;  %v63_v26 = vld [vmem:[%s3277_s1 + $0x168] sm:$0xff] }
  0x31   :  { %v1318_v23 = vpack.c.bf16 %v49_v14, %v41_v13  ;;  %v48_v24 = vld [vmem:[%s3277_s1 + $0xf0] sm:$0xff]  ;;  %v57_v27 = vld [vmem:[%s3277_s1 + $0x138] sm:$0xff]  ;;  %v79_v38 = vld [vmem:[%s3277_s1 + $0x1e8] sm:$0xff] }
  0x32   :  { %1169 = vmatpush1.bf16.msra.mxu0 %v1168_v19  ;;  %v1254_v19 = vpack.c.bf16 %v47_v12, %v39_v11  ;;  %v65_v28 = vld [vmem:[%s3277_s1 + $0x178] sm:$0xff]  ;;  %v1320_v30 = vpack.c.bf16 %v48_v24, %v40_v22  ;;  %v56_v34 = vld [vmem:[%s3277_s1 + $0x130] sm:$0xff]  ;;  %v95_v50 = vld [vmem:[%s3277_s1 + $0x268] sm:$0xff] }
  0x33   :  { %1233 = vmatpush1.bf16.msra.mxu1 %v1232_v20  ;;  %1171 = vmatprep.subr.bf16.mxu0 %v1170_v21  ;;  %v38_v20 = vld [vmem:[%s3277_s1 + $0xa0] sm:$0xff]  ;;  %v1322_v35 = vpack.c.bf16 %v65_v28, %v57_v27  ;;  %v64_v36 = vld [vmem:[%s3277_s1 + $0x170] sm:$0xff]  ;;  %v73_v39 = vld [vmem:[%s3277_s1 + $0x1b8] sm:$0xff] }
  0x34   :  { %1235 = vmatprep.subr.bf16.mxu1 %v1234_v25  ;;  %v46_v21 = vld [vmem:[%s3277_s1 + $0xe0] sm:$0xff]  ;;  %v55_v25 = vld [vmem:[%s3277_s1 + $0x128] sm:$0xff]  ;;  %v81_v40 = vld [vmem:[%s3277_s1 + $0x1f8] sm:$0xff]  ;;  %v1324_v42 = vpack.c.bf16 %v64_v36, %v56_v34 }
  0x35   :  { %v1256_v29 = vpack.c.bf16 %v46_v21, %v38_v20  ;;  %v72_v46 = vld [vmem:[%s3277_s1 + $0x1b0] sm:$0xff]  ;;  %v1326_v47 = vpack.c.bf16 %v81_v40, %v73_v39  ;;  %v89_v51 = vld [vmem:[%s3277_s1 + $0x238] sm:$0xff]  ;;  %v111_v62 = vld [vmem:[%s3277_s1 + $0x2e8] sm:$0xff] }
  0x36   :  { %1173 = vmatpush1.bf16.msra.mxu0 %v1172_v31  ;;  %v1258_v31 = vpack.c.bf16 %v63_v26, %v55_v25  ;;  %v80_v48 = vld [vmem:[%s3277_s1 + $0x1f0] sm:$0xff]  ;;  %v97_v52 = vld [vmem:[%s3277_s1 + $0x278] sm:$0xff]  ;;  %v127_v10 = vld [vmem:[%s3277_s1 + $0x368] sm:$0xff] }
  0x37   :  { %1237 = vmatpush1.bf16.msra.mxu1 %v1236_v32  ;;  %1175 = vmatprep.subr.bf16.mxu0 %v1174_v33  ;;  %v54_v32 = vld [vmem:[%s3277_s1 + $0x120] sm:$0xff]  ;;  %v1328_v54 = vpack.c.bf16 %v80_v48, %v72_v46  ;;  %v88_v58 = vld [vmem:[%s3277_s1 + $0x230] sm:$0xff]  ;;  %v1330_v59 = vpack.c.bf16 %v97_v52, %v89_v51  ;;  %v105_v63 = vld [vmem:[%s3277_s1 + $0x2b8] sm:$0xff] }
  0x38   :  { %1239 = vmatprep.subr.bf16.mxu1 %v1238_v37  ;;  %v62_v33 = vld [vmem:[%s3277_s1 + $0x160] sm:$0xff]  ;;  %v71_v37 = vld [vmem:[%s3277_s1 + $0x1a8] sm:$0xff]  ;;  %v96_v60 = vld [vmem:[%s3277_s1 + $0x270] sm:$0xff] }
  0x39   :  { %v1260_v41 = vpack.c.bf16 %v62_v33, %v54_v32  ;;  %v113_v0 = vld [vmem:[%s3277_s1 + $0x2f8] sm:$0xff]  ;;  %v1332_v2 = vpack.c.bf16 %v96_v60, %v88_v58  ;;  %v104_v6 = vld [vmem:[%s3277_s1 + $0x2b0] sm:$0xff]  ;;  %v143_v24 = vld [vmem:[%s3277_s1 + $0x3e8] sm:$0xff] }
  0x3a   :  { %1177 = vmatpush1.bf16.msra.mxu0 %v1176_v43  ;;  %v1262_v43 = vpack.c.bf16 %v79_v38, %v71_v37  ;;  %v1334_v7 = vpack.c.bf16 %v113_v0, %v105_v63  ;;  %v112_v8 = vld [vmem:[%s3277_s1 + $0x2f0] sm:$0xff]  ;;  %v121_v11 = vld [vmem:[%s3277_s1 + $0x338] sm:$0xff]  ;;  %v159_v36 = vld [vmem:[%s3277_s1 + $0x468] sm:$0xff] }
  0x3b   :  { %1241 = vmatpush1.bf16.msra.mxu1 %v1240_v44  ;;  %1179 = vmatprep.subr.bf16.mxu0 %v1178_v45  ;;  %v70_v44 = vld [vmem:[%s3277_s1 + $0x1a0] sm:$0xff]  ;;  %v129_v12 = vld [vmem:[%s3277_s1 + $0x378] sm:$0xff]  ;;  %v1336_v14 = vpack.c.bf16 %v112_v8, %v104_v6  ;;  %v120_v20 = vld [vmem:[%s3277_s1 + $0x330] sm:$0xff] }
  0x3c   :  { %1243 = vmatprep.subr.bf16.mxu1 %v1242_v49  ;;  %v78_v45 = vld [vmem:[%s3277_s1 + $0x1e0] sm:$0xff]  ;;  %v87_v49 = vld [vmem:[%s3277_s1 + $0x228] sm:$0xff]  ;;  %v1338_v21 = vpack.c.bf16 %v129_v12, %v121_v11  ;;  %v128_v22 = vld [vmem:[%s3277_s1 + $0x370] sm:$0xff] }
  0x3d   :  { %v1264_v53 = vpack.c.bf16 %v78_v45, %v70_v44  ;;  %v137_v25 = vld [vmem:[%s3277_s1 + $0x3b8] sm:$0xff]  ;;  %v1340_v28 = vpack.c.bf16 %v128_v22, %v120_v20  ;;  %v136_v32 = vld [vmem:[%s3277_s1 + $0x3b0] sm:$0xff]  ;;  %v175_v48 = vld [vmem:[%s3277_s1 + $0x4e8] sm:$0xff] }
  0x3e   :  { %1181 = vmatpush1.bf16.msra.mxu0 %v1180_v55  ;;  %v1266_v55 = vpack.c.bf16 %v95_v50, %v87_v49  ;;  %v145_v26 = vld [vmem:[%s3277_s1 + $0x3f8] sm:$0xff]  ;;  %v144_v34 = vld [vmem:[%s3277_s1 + $0x3f0] sm:$0xff]  ;;  %v191_v60 = vld [vmem:[%s3277_s1 + $0x568] sm:$0xff] }
  0x3f   :  { %1245 = vmatpush1.bf16.msra.mxu1 %v1244_v56  ;;  %1183 = vmatprep.subr.bf16.mxu0 %v1182_v57  ;;  %v86_v56 = vld [vmem:[%s3277_s1 + $0x220] sm:$0xff]  ;;  %v1342_v33 = vpack.c.bf16 %v145_v26, %v137_v25  ;;  %v153_v37 = vld [vmem:[%s3277_s1 + $0x438] sm:$0xff]  ;;  %v1344_v40 = vpack.c.bf16 %v144_v34, %v136_v32  ;;  %v152_v44 = vld [vmem:[%s3277_s1 + $0x430] sm:$0xff] }
  0x40   :  { %1247 = vmatprep.subr.bf16.mxu1 %v1246_v61  ;;  %v94_v57 = vld [vmem:[%s3277_s1 + $0x260] sm:$0xff]  ;;  %v103_v61 = vld [vmem:[%s3277_s1 + $0x2a8] sm:$0xff]  ;;  %v161_v38 = vld [vmem:[%s3277_s1 + $0x478] sm:$0xff] }
  0x41   :  { %v1268_v1 = vpack.c.bf16 %v94_v57, %v86_v56  ;;  %v1346_v45 = vpack.c.bf16 %v161_v38, %v153_v37  ;;  %v160_v46 = vld [vmem:[%s3277_s1 + $0x470] sm:$0xff]  ;;  %v169_v49 = vld [vmem:[%s3277_s1 + $0x4b8] sm:$0xff]  ;;  %v207_v8 = vld [vmem:[%s3277_s1 + $0x5e8] sm:$0xff] }
  0x42   :  { %1185 = vmatpush1.bf16.msra.mxu0 %v1184_v3  ;;  %v1270_v3 = vpack.c.bf16 %v111_v62, %v103_v61  ;;  %v177_v50 = vld [vmem:[%s3277_s1 + $0x4f8] sm:$0xff]  ;;  %v1348_v52 = vpack.c.bf16 %v160_v46, %v152_v44  ;;  %v168_v56 = vld [vmem:[%s3277_s1 + $0x4b0] sm:$0xff]  ;;  %v223_v22 = vld [vmem:[%s3277_s1 + $0x668] sm:$0xff] }
  0x43   :  { %1249 = vmatpush1.bf16.msra.mxu1 %v1248_v4  ;;  %1251 = vmatprep.subr.bf16.mxu0 %v1250_v5  ;;  %v102_v4 = vld [vmem:[%s3277_s1 + $0x2a0] sm:$0xff]  ;;  %v1350_v57 = vpack.c.bf16 %v177_v50, %v169_v49  ;;  %v176_v58 = vld [vmem:[%s3277_s1 + $0x4f0] sm:$0xff]  ;;  %v185_v61 = vld [vmem:[%s3277_s1 + $0x538] sm:$0xff] }
  0x44   :  { %1315 = vmatprep.subr.bf16.mxu1 %v1314_v9  ;;  %v110_v5 = vld [vmem:[%s3277_s1 + $0x2e0] sm:$0xff]  ;;  %v119_v9 = vld [vmem:[%s3277_s1 + $0x328] sm:$0xff]  ;;  %v193_v62 = vld [vmem:[%s3277_s1 + $0x578] sm:$0xff]  ;;  %v1352_v0 = vpack.c.bf16 %v176_v58, %v168_v56 }
  0x45   :  { %339 = vmatmul.mubr.f32.vlgmr.msra.gmra.mrb[0].mxu0 %v2091_v15  ;;  %v1272_v13 = vpack.c.bf16 %v110_v5, %v102_v4  ;;  %v184_v4 = vld [vmem:[%s3277_s1 + $0x530] sm:$0xff]  ;;  %v1354_v5 = vpack.c.bf16 %v193_v62, %v185_v61  ;;  %v239_v34 = vld [vmem:[%s3277_s1 + $0x6e8] sm:$0xff] }
  0x46   :  { %410 = vmatmul.mubr.f32.vlgmr.msra.gmra.mrb[0].mxu1 %v2091_v15  ;;  %1253 = vmatpush1.bf16.msra.mxu0 %v1252_v17  ;;  %v1274_v17 = vpack.c.bf16 %v127_v10, %v119_v9  ;;  %v192_v6 = vld [vmem:[%s3277_s1 + $0x570] sm:$0xff]  ;;  %v201_v9 = vld [vmem:[%s3277_s1 + $0x5b8] sm:$0xff]  ;;  %v255_v46 = vld [vmem:[%s3277_s1 + $0x768] sm:$0xff] }
  0x47   :  { %1317 = vmatpush1.bf16.msra.mxu1 %v1316_v18  ;;  %1255 = vmatprep.subr.bf16.mxu0 %v1254_v19  ;;  %v118_v18 = vld [vmem:[%s3277_s1 + $0x320] sm:$0xff]  ;;  %v209_v10 = vld [vmem:[%s3277_s1 + $0x5f8] sm:$0xff]  ;;  %v1356_v12 = vpack.c.bf16 %v192_v6, %v184_v4  ;;  %v208_v20 = vld [vmem:[%s3277_s1 + $0x5f0] sm:$0xff] }
  0x48   :  { %1319 = vmatprep.subr.bf16.mxu1 %v1318_v23  ;;  %480 = vmatprep.mubr.f32.mxu0 %v1958_v16  ;;  %v126_v19 = vld [vmem:[%s3277_s1 + $0x360] sm:$0xff]  ;;  %v135_v23 = vld [vmem:[%s3277_s1 + $0x3a8] sm:$0xff]  ;;  %v224_v32 = vld [vmem:[%s3277_s1 + $0x670] sm:$0xff] }
  0x49   :  { %551 = vmatprep.mubr.f32.mxu1 %v1958_v16  ;;  %v1276_v27 = vpack.c.bf16 %v126_v19, %v118_v18  ;;  %v200_v18 = vld [vmem:[%s3277_s1 + $0x5b0] sm:$0xff]  ;;  %v1358_v19 = vpack.c.bf16 %v209_v10, %v201_v9  ;;  %v271_v58 = vld [vmem:[%s3277_s1 + $0x7e8] sm:$0xff] }
  0x4a   :  { %1257 = vmatpush1.bf16.msra.mxu0 %v1256_v29  ;;  %v1278_v29 = vpack.c.bf16 %v143_v24, %v135_v23  ;;  %v217_v23 = vld [vmem:[%s3277_s1 + $0x638] sm:$0xff]  ;;  %v1360_v26 = vpack.c.bf16 %v208_v20, %v200_v18  ;;  %v240_v44 = vld [vmem:[%s3277_s1 + $0x6f0] sm:$0xff]  ;;  %v575_v6 = vld [vmem:[%s3279_s2 + $0x48] sm:$0xff] }
  0x4b   :  { %1321 = vmatpush1.bf16.msra.mxu1 %v1320_v30  ;;  %1259 = vmatprep.subr.bf16.mxu0 %v1258_v31  ;;  %v134_v30 = vld [vmem:[%s3277_s1 + $0x3a0] sm:$0xff]  ;;  %v225_v24 = vld [vmem:[%s3277_s1 + $0x678] sm:$0xff]  ;;  %v256_v56 = vld [vmem:[%s3277_s1 + $0x770] sm:$0xff] }
  0x4c   :  { %1323 = vmatprep.subr.bf16.mxu1 %v1322_v35  ;;  %v142_v31 = vld [vmem:[%s3277_s1 + $0x3e0] sm:$0xff]  ;;  %v151_v35 = vld [vmem:[%s3277_s1 + $0x428] sm:$0xff]  ;;  %v272_v4 = vld [vmem:[%s3277_s1 + $0x7f0] sm:$0xff] }
  0x4d   :  { %v1280_v39 = vpack.c.bf16 %v142_v31, %v134_v30  ;;  %v216_v30 = vld [vmem:[%s3277_s1 + $0x630] sm:$0xff]  ;;  %v1362_v31 = vpack.c.bf16 %v225_v24, %v217_v23  ;;  %v591_v20 = vld [vmem:[%s3279_s2 + $0xc8] sm:$0xff] }
  0x4e   :  { %1261 = vmatpush1.bf16.msra.mxu0 %v1260_v41  ;;  %v1282_v41 = vpack.c.bf16 %v159_v36, %v151_v35  ;;  %v233_v35 = vld [vmem:[%s3277_s1 + $0x6b8] sm:$0xff]  ;;  %v1364_v38 = vpack.c.bf16 %v224_v32, %v216_v30  ;;  %v576_v18 = vld [vmem:[%s3279_s2 + $0x50] sm:$0xff]  ;;  %v607_v32 = vld [vmem:[%s3279_s2 + $0x148] sm:$0xff] }
  0x4f   :  { %1325 = vmatpush1.bf16.msra.mxu1 %v1324_v42  ;;  %1263 = vmatprep.subr.bf16.mxu0 %v1262_v43  ;;  %v150_v42 = vld [vmem:[%s3277_s1 + $0x420] sm:$0xff]  ;;  %v241_v36 = vld [vmem:[%s3277_s1 + $0x6f8] sm:$0xff]  ;;  %v592_v30 = vld [vmem:[%s3279_s2 + $0xd0] sm:$0xff] }
  0x50   :  { %1327 = vmatprep.subr.bf16.mxu1 %v1326_v47  ;;  %v158_v43 = vld [vmem:[%s3277_s1 + $0x460] sm:$0xff]  ;;  %v167_v47 = vld [vmem:[%s3277_s1 + $0x4a8] sm:$0xff] }
  0x51   :  { %v1284_v51 = vpack.c.bf16 %v158_v43, %v150_v42  ;;  %v232_v42 = vld [vmem:[%s3277_s1 + $0x6b0] sm:$0xff]  ;;  %v1366_v43 = vpack.c.bf16 %v241_v36, %v233_v35 }
  0x52   :  { %1265 = vmatpush1.bf16.msra.mxu0 %v1264_v53  ;;  %v1286_v53 = vpack.c.bf16 %v175_v48, %v167_v47  ;;  %v249_v47 = vld [vmem:[%s3277_s1 + $0x738] sm:$0xff]  ;;  %v1368_v50 = vpack.c.bf16 %v240_v44, %v232_v42  ;;  %v615_v42 = vld [vmem:[%s3279_s2 + $0x188] sm:$0xff] }
  0x53   :  { %1329 = vmatpush1.bf16.msra.mxu1 %v1328_v54  ;;  %1267 = vmatprep.subr.bf16.mxu0 %v1266_v55  ;;  %v166_v54 = vld [vmem:[%s3277_s1 + $0x4a0] sm:$0xff]  ;;  %v257_v48 = vld [vmem:[%s3277_s1 + $0x778] sm:$0xff] }
  0x54   :  { %1331 = vmatprep.subr.bf16.mxu1 %v1330_v59  ;;  %v174_v55 = vld [vmem:[%s3277_s1 + $0x4e0] sm:$0xff]  ;;  %v183_v59 = vld [vmem:[%s3277_s1 + $0x528] sm:$0xff]  ;;  %v617_v44 = vld [vmem:[%s3279_s2 + $0x198] sm:$0xff] }
  0x55   :  { %v1288_v63 = vpack.c.bf16 %v174_v55, %v166_v54  ;;  %v248_v54 = vld [vmem:[%s3277_s1 + $0x730] sm:$0xff]  ;;  %v1370_v55 = vpack.c.bf16 %v257_v48, %v249_v47 }
  0x56   :  { %1269 = vmatpush1.bf16.msra.mxu0 %v1268_v1  ;;  %v1290_v1 = vpack.c.bf16 %v191_v60, %v183_v59  ;;  %v265_v59 = vld [vmem:[%s3277_s1 + $0x7b8] sm:$0xff]  ;;  %v1372_v62 = vpack.c.bf16 %v256_v56, %v248_v54  ;;  %v639_v54 = vld [vmem:[%s3279_s2 + $0x248] sm:$0xff] }
  0x57   :  { %1333 = vmatpush1.bf16.msra.mxu1 %v1332_v2  ;;  %1271 = vmatprep.subr.bf16.mxu0 %v1270_v3  ;;  %v182_v2 = vld [vmem:[%s3277_s1 + $0x520] sm:$0xff]  ;;  %v273_v60 = vld [vmem:[%s3277_s1 + $0x7f8] sm:$0xff] }
  0x58   :  { %1335 = vmatprep.subr.bf16.mxu1 %v1334_v7  ;;  %v190_v3 = vld [vmem:[%s3277_s1 + $0x560] sm:$0xff]  ;;  %v199_v7 = vld [vmem:[%s3277_s1 + $0x5a8] sm:$0xff]  ;;  %v641_v56 = vld [vmem:[%s3279_s2 + $0x258] sm:$0xff] }
  0x59   :  { %v1292_v11 = vpack.c.bf16 %v190_v3, %v182_v2  ;;  %v264_v2 = vld [vmem:[%s3277_s1 + $0x7b0] sm:$0xff]  ;;  %v1374_v3 = vpack.c.bf16 %v273_v60, %v265_v59  ;;  %v630_v60 = vld [vmem:[%s3279_s2 + $0x200] sm:$0xff] }
  0x5a   :  { %1273 = vmatpush1.bf16.msra.mxu0 %v1272_v13  ;;  %v1294_v13 = vpack.c.bf16 %v207_v8, %v199_v7  ;;  %v569_v7 = vld [vmem:[%s3279_s2 + $0x18] sm:$0xff]  ;;  %v1376_v10 = vpack.c.bf16 %v272_v4, %v264_v2  ;;  %v655_v2 = vld [vmem:[%s3279_s2 + $0x2c8] sm:$0xff] }
  0x5b   :  { %1337 = vmatpush1.bf16.msra.mxu1 %v1336_v14  ;;  %1275 = vmatprep.subr.bf16.mxu0 %v1274_v17  ;;  %v198_v14 = vld [vmem:[%s3277_s1 + $0x5a0] sm:$0xff]  ;;  %v577_v8 = vld [vmem:[%s3279_s2 + $0x58] sm:$0xff] }
  0x5c   :  { %1339 = vmatprep.subr.bf16.mxu1 %v1338_v21  ;;  %v206_v17 = vld [vmem:[%s3277_s1 + $0x5e0] sm:$0xff]  ;;  %v215_v21 = vld [vmem:[%s3277_s1 + $0x628] sm:$0xff]  ;;  %v657_v4 = vld [vmem:[%s3279_s2 + $0x2d8] sm:$0xff] }
  0x5d   :  { %v1296_v25 = vpack.c.bf16 %v206_v17, %v198_v14  ;;  %v568_v14 = vld [vmem:[%s3279_s2 + $0x10] sm:$0xff]  ;;  %v1442_v17 = vpack.c.bf16 %v577_v8, %v569_v7  ;;  %v646_v8 = vld [vmem:[%s3279_s2 + $0x280] sm:$0xff] }
  0x5e   :  { %1277 = vmatpush1.bf16.msra.mxu0 %v1276_v27  ;;  %v1298_v27 = vpack.c.bf16 %v223_v22, %v215_v21  ;;  %v585_v21 = vld [vmem:[%s3279_s2 + $0x98] sm:$0xff]  ;;  %v1444_v24 = vpack.c.bf16 %v576_v18, %v568_v14  ;;  %v671_v14 = vld [vmem:[%s3279_s2 + $0x348] sm:$0xff] }
  0x5f   :  { %1341 = vmatpush1.bf16.msra.mxu1 %v1340_v28  ;;  %1279 = vmatprep.subr.bf16.mxu0 %v1278_v29  ;;  %v214_v28 = vld [vmem:[%s3277_s1 + $0x620] sm:$0xff]  ;;  %v593_v22 = vld [vmem:[%s3279_s2 + $0xd8] sm:$0xff] }
  0x60   :  { %1343 = vmatprep.subr.bf16.mxu1 %v1342_v33  ;;  %v222_v29 = vld [vmem:[%s3277_s1 + $0x660] sm:$0xff]  ;;  %v231_v33 = vld [vmem:[%s3277_s1 + $0x6a8] sm:$0xff]  ;;  %v673_v18 = vld [vmem:[%s3279_s2 + $0x358] sm:$0xff] }
  0x61   :  { %v1300_v37 = vpack.c.bf16 %v222_v29, %v214_v28  ;;  %v584_v28 = vld [vmem:[%s3279_s2 + $0x90] sm:$0xff]  ;;  %v1446_v29 = vpack.c.bf16 %v593_v22, %v585_v21  ;;  %v662_v22 = vld [vmem:[%s3279_s2 + $0x300] sm:$0xff] }
  0x62   :  { %1281 = vmatpush1.bf16.msra.mxu0 %v1280_v39  ;;  %v1302_v39 = vpack.c.bf16 %v239_v34, %v231_v33  ;;  %v601_v33 = vld [vmem:[%s3279_s2 + $0x118] sm:$0xff]  ;;  %v1448_v36 = vpack.c.bf16 %v592_v30, %v584_v28  ;;  %v687_v28 = vld [vmem:[%s3279_s2 + $0x3c8] sm:$0xff] }
  0x63   :  { %1345 = vmatpush1.bf16.msra.mxu1 %v1344_v40  ;;  %1283 = vmatprep.subr.bf16.mxu0 %v1282_v41  ;;  %v230_v40 = vld [vmem:[%s3277_s1 + $0x6a0] sm:$0xff]  ;;  %v609_v34 = vld [vmem:[%s3279_s2 + $0x158] sm:$0xff] }
  0x64   :  { %1347 = vmatprep.subr.bf16.mxu1 %v1346_v45  ;;  %v238_v41 = vld [vmem:[%s3277_s1 + $0x6e0] sm:$0xff]  ;;  %v247_v45 = vld [vmem:[%s3277_s1 + $0x728] sm:$0xff]  ;;  %v689_v30 = vld [vmem:[%s3279_s2 + $0x3d8] sm:$0xff] }
  0x65   :  { %v1304_v49 = vpack.c.bf16 %v238_v41, %v230_v40  ;;  %v600_v40 = vld [vmem:[%s3279_s2 + $0x110] sm:$0xff] }
  0x66   :  { %1285 = vmatpush1.bf16.msra.mxu0 %v1284_v51  ;;  %v1306_v51 = vpack.c.bf16 %v255_v46, %v247_v45  ;;  %v608_v41 = vld [vmem:[%s3279_s2 + $0x150] sm:$0xff]  ;;  %v625_v45 = vld [vmem:[%s3279_s2 + $0x1d8] sm:$0xff] }
  0x67   :  { %1349 = vmatpush1.bf16.msra.mxu1 %v1348_v52  ;;  %1287 = vmatprep.subr.bf16.mxu0 %v1286_v53  ;;  %v246_v52 = vld [vmem:[%s3277_s1 + $0x720] sm:$0xff]  ;;  %v1452_v47 = vpack.c.bf16 %v608_v41, %v600_v40  ;;  %v703_v40 = vld [vmem:[%s3279_s2 + $0x448] sm:$0xff]  ;;  %v705_v41 = vld [vmem:[%s3279_s2 + $0x458] sm:$0xff] }
  0x68   :  { %1351 = vmatprep.subr.bf16.mxu1 %v1350_v57  ;;  %v254_v53 = vld [vmem:[%s3277_s1 + $0x760] sm:$0xff]  ;;  %v263_v57 = vld [vmem:[%s3277_s1 + $0x7a8] sm:$0xff] }
  0x69   :  { %v1308_v61 = vpack.c.bf16 %v254_v53, %v246_v52  ;;  %v624_v52 = vld [vmem:[%s3279_s2 + $0x1d0] sm:$0xff]  ;;  %v631_v53 = vld [vmem:[%s3279_s2 + $0x208] sm:$0xff] }
  0x6a   :  { %1289 = vmatpush1.bf16.msra.mxu0 %v1288_v63  ;;  %v1310_v63 = vpack.c.bf16 %v271_v58, %v263_v57  ;;  %v1394_v59 = vpack.c.bf16 %v639_v54, %v631_v53 }
  0x6b   :  { %1353 = vmatpush1.bf16.msra.mxu1 %v1352_v0  ;;  %1291 = vmatprep.subr.bf16.mxu0 %v1290_v1  ;;  %v262_v0 = vld [vmem:[%s3277_s1 + $0x7a0] sm:$0xff] }
  0x6c   :  { %1355 = vmatprep.subr.bf16.mxu1 %v1354_v5  ;;  %v270_v1 = vld [vmem:[%s3277_s1 + $0x7e0] sm:$0xff]  ;;  %v567_v5 = vld [vmem:[%s3279_s2 + $0x8] sm:$0xff] }
  0x6d   :  { %v1312_v9 = vpack.c.bf16 %v270_v1, %v262_v0  ;;  %v640_v0 = vld [vmem:[%s3279_s2 + $0x250] sm:$0xff]  ;;  %v647_v1 = vld [vmem:[%s3279_s2 + $0x288] sm:$0xff] }
  0x6e   :  { %1293 = vmatpush1.bf16.msra.mxu0 %v1292_v11  ;;  %v1378_v11 = vpack.c.bf16 %v575_v6, %v567_v5  ;;  %v1398_v7 = vpack.c.bf16 %v655_v2, %v647_v1 }
  0x6f   :  { %1357 = vmatpush1.bf16.msra.mxu1 %v1356_v12  ;;  %1295 = vmatprep.subr.bf16.mxu0 %v1294_v13  ;;  %v566_v12 = vld [vmem:[%s3279_s2] sm:$0xff] }
  0x70   :  { %1359 = vmatprep.subr.bf16.mxu1 %v1358_v19  ;;  %v574_v13 = vld [vmem:[%s3279_s2 + $0x40] sm:$0xff]  ;;  %v583_v19 = vld [vmem:[%s3279_s2 + $0x88] sm:$0xff] }
  0x71   :  { %v1380_v23 = vpack.c.bf16 %v574_v13, %v566_v12  ;;  %v656_v12 = vld [vmem:[%s3279_s2 + $0x2d0] sm:$0xff]  ;;  %v663_v13 = vld [vmem:[%s3279_s2 + $0x308] sm:$0xff] }
  0x72   :  { %1297 = vmatpush1.bf16.msra.mxu0 %v1296_v25  ;;  %v1382_v25 = vpack.c.bf16 %v591_v20, %v583_v19  ;;  %v1402_v21 = vpack.c.bf16 %v671_v14, %v663_v13 }
  0x73   :  { %1361 = vmatpush1.bf16.msra.mxu1 %v1360_v26  ;;  %1299 = vmatprep.subr.bf16.mxu0 %v1298_v27  ;;  %v582_v26 = vld [vmem:[%s3279_s2 + $0x80] sm:$0xff] }
  0x74   :  { %1363 = vmatprep.subr.bf16.mxu1 %v1362_v31  ;;  %v590_v27 = vld [vmem:[%s3279_s2 + $0xc0] sm:$0xff]  ;;  %v599_v31 = vld [vmem:[%s3279_s2 + $0x108] sm:$0xff] }
  0x75   :  { %v1384_v35 = vpack.c.bf16 %v590_v27, %v582_v26  ;;  %v672_v26 = vld [vmem:[%s3279_s2 + $0x350] sm:$0xff]  ;;  %v679_v27 = vld [vmem:[%s3279_s2 + $0x388] sm:$0xff] }
  0x76   :  { %1301 = vmatpush1.bf16.msra.mxu0 %v1300_v37  ;;  %v1386_v37 = vpack.c.bf16 %v607_v32, %v599_v31 }
  0x77   :  { %1365 = vmatpush1.bf16.msra.mxu1 %v1364_v38  ;;  %1303 = vmatprep.subr.bf16.mxu0 %v1302_v39  ;;  %v598_v38 = vld [vmem:[%s3279_s2 + $0x100] sm:$0xff] }
  0x78   :  { %1367 = vmatprep.subr.bf16.mxu1 %v1366_v43  ;;  %v606_v39 = vld [vmem:[%s3279_s2 + $0x140] sm:$0xff]  ;;  %v623_v43 = vld [vmem:[%s3279_s2 + $0x1c8] sm:$0xff] }
  0x79   :  { %v1388_v46 = vpack.c.bf16 %v606_v39, %v598_v38  ;;  %v1390_v48 = vpack.c.bf16 %v623_v43, %v615_v42  ;;  %v688_v38 = vld [vmem:[%s3279_s2 + $0x3d0] sm:$0xff]  ;;  %v695_v39 = vld [vmem:[%s3279_s2 + $0x408] sm:$0xff] }
  0x7a   :  { %1305 = vmatpush1.bf16.msra.mxu0 %v1304_v49  ;;  %v614_v49 = vld [vmem:[%s3279_s2 + $0x180] sm:$0xff] }
  0x7b   :  { %1369 = vmatpush1.bf16.msra.mxu1 %v1368_v50  ;;  %1307 = vmatprep.subr.bf16.mxu0 %v1306_v51  ;;  %v622_v50 = vld [vmem:[%s3279_s2 + $0x1c0] sm:$0xff]  ;;  %v616_v51 = vld [vmem:[%s3279_s2 + $0x190] sm:$0xff] }
  0x7c   :  { %1371 = vmatprep.subr.bf16.mxu1 %v1370_v55  ;;  %v633_v55 = vld [vmem:[%s3279_s2 + $0x218] sm:$0xff]  ;;  %v1392_v57 = vpack.c.bf16 %v622_v50, %v614_v49  ;;  %v1456_v58 = vpack.c.bf16 %v624_v52, %v616_v51  ;;  %v704_v49 = vld [vmem:[%s3279_s2 + $0x450] sm:$0xff]  ;;  %v711_v50 = vld [vmem:[%s3279_s2 + $0x488] sm:$0xff] }
  0x7d   :  { %v719_v51 = vld [vmem:[%s3279_s2 + $0x4c8] sm:$0xff]  ;;  %v721_v52 = vld [vmem:[%s3279_s2 + $0x4d8] sm:$0xff] }
  0x7e   :  { %1309 = vmatpush1.bf16.msra.mxu0 %v1308_v61  ;;  %v638_v61 = vld [vmem:[%s3279_s2 + $0x240] sm:$0xff] }
  0x7f   :  { %1373 = vmatpush1.bf16.msra.mxu1 %v1372_v62  ;;  %1311 = vmatprep.subr.bf16.mxu0 %v1310_v63  ;;  %v632_v62 = vld [vmem:[%s3279_s2 + $0x210] sm:$0xff]  ;;  %v1458_v63 = vpack.c.bf16 %v641_v56, %v633_v55  ;;  %v1396_v5 = vpack.c.bf16 %v638_v61, %v630_v60  ;;  %v1414_v55 = vpack.c.bf16 %v719_v51, %v711_v50  ;;  %v710_v56 = vld [vmem:[%s3279_s2 + $0x480] sm:$0xff]  ;;  %v727_v61 = vld [vmem:[%s3279_s2 + $0x508] sm:$0xff] }
  0x80   :  { %1375 = vmatprep.subr.bf16.mxu1 %v1374_v3  ;;  %v649_v3 = vld [vmem:[%s3279_s2 + $0x298] sm:$0xff]  ;;  %v1460_v6 = vpack.c.bf16 %v640_v0, %v632_v62  ;;  %v720_v60 = vld [vmem:[%s3279_s2 + $0x4d0] sm:$0xff]  ;;  %v735_v62 = vld [vmem:[%s3279_s2 + $0x548] sm:$0xff] }
  0x81   :  { %v737_v0 = vld [vmem:[%s3279_s2 + $0x558] sm:$0xff] }
  0x82   :  { %1313 = vmatpush1.bf16.msra.mxu0 %v1312_v9  ;;  %v654_v9 = vld [vmem:[%s3279_s2 + $0x2c0] sm:$0xff] }
  0x83   :  { %1377 = vmatpush1.bf16.msra.mxu1 %v1376_v10  ;;  %1379 = vmatprep.subr.bf16.mxu0 %v1378_v11  ;;  %v648_v10 = vld [vmem:[%s3279_s2 + $0x290] sm:$0xff]  ;;  %v1462_v11 = vpack.c.bf16 %v657_v4, %v649_v3  ;;  %v1400_v19 = vpack.c.bf16 %v654_v9, %v646_v8  ;;  %v1418_v3 = vpack.c.bf16 %v735_v62, %v727_v61  ;;  %v726_v4 = vld [vmem:[%s3279_s2 + $0x500] sm:$0xff]  ;;  %v743_v9 = vld [vmem:[%s3279_s2 + $0x588] sm:$0xff] }
  0x84   :  { %1443 = vmatprep.subr.bf16.mxu1 %v1442_v17  ;;  %v665_v17 = vld [vmem:[%s3279_s2 + $0x318] sm:$0xff]  ;;  %v1464_v20 = vpack.c.bf16 %v656_v12, %v648_v10  ;;  %v736_v8 = vld [vmem:[%s3279_s2 + $0x550] sm:$0xff]  ;;  %v751_v10 = vld [vmem:[%s3279_s2 + $0x5c8] sm:$0xff] }
  0x85   :  { %481 = vmatmul.mubr.f32.vlgmr.msra.gmra.mrb[2].mxu0 %v2091_v15  ;;  %v753_v12 = vld [vmem:[%s3279_s2 + $0x5d8] sm:$0xff] }
  0x86   :  { %552 = vmatmul.mubr.f32.vlgmr.msra.gmra.mrb[2].mxu1 %v2091_v15  ;;  %1381 = vmatpush1.bf16.msra.mxu0 %v1380_v23  ;;  %v1450_v15 = vpack.c.bf16 %v609_v34, %v601_v33  ;;  %v670_v23 = vld [vmem:[%s3279_s2 + $0x340] sm:$0xff]  ;;  %v1406_v33 = vpack.c.bf16 %v687_v28, %v679_v27 }
  0x87   :  { %1445 = vmatpush1.bf16.msra.mxu1 %v1444_v24  ;;  %1383 = vmatprep.subr.bf16.mxu0 %v1382_v25  ;;  %v664_v24 = vld [vmem:[%s3279_s2 + $0x310] sm:$0xff]  ;;  %v1466_v25 = vpack.c.bf16 %v673_v18, %v665_v17  ;;  %v1404_v31 = vpack.c.bf16 %v670_v23, %v662_v22  ;;  %v678_v34 = vld [vmem:[%s3279_s2 + $0x380] sm:$0xff]  ;;  %v1422_v17 = vpack.c.bf16 %v751_v10, %v743_v9  ;;  %v759_v23 = vld [vmem:[%s3279_s2 + $0x608] sm:$0xff] }
  0x88   :  { %1447 = vmatprep.subr.bf16.mxu1 %v1446_v29  ;;  %886 = vmatprep.mubr.f32.mxu0 %v1958_v16  ;;  %v681_v29 = vld [vmem:[%s3279_s2 + $0x398] sm:$0xff]  ;;  %v1468_v32 = vpack.c.bf16 %v672_v26, %v664_v24  ;;  %v742_v18 = vld [vmem:[%s3279_s2 + $0x580] sm:$0xff]  ;;  %v752_v22 = vld [vmem:[%s3279_s2 + $0x5d0] sm:$0xff] }
  0x89   :  { %957 = vmatprep.mubr.f32.mxu1 %v1958_v16  ;;  %v1454_v16 = vpack.c.bf16 %v625_v45, %v617_v44  ;;  %v1410_v44 = vpack.c.bf16 %v703_v40, %v695_v39  ;;  %v694_v45 = vld [vmem:[%s3279_s2 + $0x400] sm:$0xff]  ;;  %v767_v24 = vld [vmem:[%s3279_s2 + $0x648] sm:$0xff]  ;;  %v769_v26 = vld [vmem:[%s3279_s2 + $0x658] sm:$0xff] }
  0x8a   :  { %1385 = vmatpush1.bf16.msra.mxu0 %v1384_v35  ;;  %v686_v35 = vld [vmem:[%s3279_s2 + $0x3c0] sm:$0xff] }
  0x8b   :  { %1449 = vmatpush1.bf16.msra.mxu1 %v1448_v36  ;;  %1387 = vmatprep.subr.bf16.mxu0 %v1386_v37  ;;  %v680_v36 = vld [vmem:[%s3279_s2 + $0x390] sm:$0xff]  ;;  %v1470_v37 = vpack.c.bf16 %v689_v30, %v681_v29  ;;  %v1408_v42 = vpack.c.bf16 %v686_v35, %v678_v34  ;;  %v1426_v29 = vpack.c.bf16 %v767_v24, %v759_v23  ;;  %v758_v30 = vld [vmem:[%s3279_s2 + $0x600] sm:$0xff]  ;;  %v775_v35 = vld [vmem:[%s3279_s2 + $0x688] sm:$0xff] }
  0x8c   :  { %1451 = vmatprep.subr.bf16.mxu1 %v1450_v15  ;;  %v697_v15 = vld [vmem:[%s3279_s2 + $0x418] sm:$0xff]  ;;  %v1472_v43 = vpack.c.bf16 %v688_v38, %v680_v36  ;;  %v768_v34 = vld [vmem:[%s3279_s2 + $0x650] sm:$0xff]  ;;  %v783_v36 = vld [vmem:[%s3279_s2 + $0x6c8] sm:$0xff] }
  0x8d   :  { %v785_v38 = vld [vmem:[%s3279_s2 + $0x6d8] sm:$0xff] }
  0x8e   :  { %1389 = vmatpush1.bf16.msra.mxu0 %v1388_v46  ;;  %v702_v46 = vld [vmem:[%s3279_s2 + $0x440] sm:$0xff] }
  0x8f   :  { %1453 = vmatpush1.bf16.msra.mxu1 %v1452_v47  ;;  %1391 = vmatprep.subr.bf16.mxu0 %v1390_v48  ;;  %v696_v47 = vld [vmem:[%s3279_s2 + $0x410] sm:$0xff]  ;;  %v1474_v48 = vpack.c.bf16 %v705_v41, %v697_v15  ;;  %v1412_v53 = vpack.c.bf16 %v702_v46, %v694_v45  ;;  %v1430_v15 = vpack.c.bf16 %v783_v36, %v775_v35  ;;  %v774_v41 = vld [vmem:[%s3279_s2 + $0x680] sm:$0xff]  ;;  %v791_v46 = vld [vmem:[%s3279_s2 + $0x708] sm:$0xff] }
  0x90   :  { %1455 = vmatprep.subr.bf16.mxu1 %v1454_v16  ;;  %v713_v16 = vld [vmem:[%s3279_s2 + $0x498] sm:$0xff]  ;;  %v1476_v54 = vpack.c.bf16 %v704_v49, %v696_v47  ;;  %v784_v45 = vld [vmem:[%s3279_s2 + $0x6d0] sm:$0xff]  ;;  %v799_v47 = vld [vmem:[%s3279_s2 + $0x748] sm:$0xff] }
  0x91   :  { %v801_v49 = vld [vmem:[%s3279_s2 + $0x758] sm:$0xff] }
  0x92   :  { %1393 = vmatpush1.bf16.msra.mxu0 %v1392_v57  ;;  %v718_v57 = vld [vmem:[%s3279_s2 + $0x4c0] sm:$0xff]  ;;  %v613_v35 = vld [vmem:[%s3279_s2 + $0x178] sm:$0xff] }
  0x93   :  { %1457 = vmatpush1.bf16.msra.mxu1 %v1456_v58  ;;  %1395 = vmatprep.subr.bf16.mxu0 %v1394_v59  ;;  %v712_v58 = vld [vmem:[%s3279_s2 + $0x490] sm:$0xff]  ;;  %v1478_v59 = vpack.c.bf16 %v721_v52, %v713_v16  ;;  %v1416_v1 = vpack.c.bf16 %v718_v57, %v710_v56  ;;  %v1434_v16 = vpack.c.bf16 %v799_v47, %v791_v46  ;;  %v790_v52 = vld [vmem:[%s3279_s2 + $0x700] sm:$0xff]  ;;  %v807_v57 = vld [vmem:[%s3279_s2 + $0x788] sm:$0xff] }
  0x94   :  { %1459 = vmatprep.subr.bf16.mxu1 %v1458_v63  ;;  %v729_v63 = vld [vmem:[%s3279_s2 + $0x518] sm:$0xff]  ;;  %v1480_v2 = vpack.c.bf16 %v720_v60, %v712_v58  ;;  %v800_v56 = vld [vmem:[%s3279_s2 + $0x750] sm:$0xff]  ;;  %v815_v58 = vld [vmem:[%s3279_s2 + $0x7c8] sm:$0xff] }
  0x95   :  { %v817_v60 = vld [vmem:[%s3279_s2 + $0x7d8] sm:$0xff] }
  0x96   :  { %1397 = vmatpush1.bf16.msra.mxu0 %v1396_v5  ;;  %v734_v5 = vld [vmem:[%s3279_s2 + $0x540] sm:$0xff]  ;;  %v621_v46 = vld [vmem:[%s3279_s2 + $0x1b8] sm:$0xff] }
  0x97   :  { %1461 = vmatpush1.bf16.msra.mxu1 %v1460_v6  ;;  %1399 = vmatprep.subr.bf16.mxu0 %v1398_v7  ;;  %v728_v6 = vld [vmem:[%s3279_s2 + $0x510] sm:$0xff]  ;;  %v1482_v7 = vpack.c.bf16 %v737_v0, %v729_v63  ;;  %v1420_v13 = vpack.c.bf16 %v734_v5, %v726_v4  ;;  %v1438_v63 = vpack.c.bf16 %v815_v58, %v807_v57  ;;  %v806_v0 = vld [vmem:[%s3279_s2 + $0x780] sm:$0xff]  ;;  %v571_v5 = vld [vmem:[%s3279_s2 + $0x28] sm:$0xff] }
  0x98   :  { %1463 = vmatprep.subr.bf16.mxu1 %v1462_v11  ;;  %v745_v11 = vld [vmem:[%s3279_s2 + $0x598] sm:$0xff]  ;;  %v1484_v14 = vpack.c.bf16 %v736_v8, %v728_v6  ;;  %v816_v4 = vld [vmem:[%s3279_s2 + $0x7d0] sm:$0xff]  ;;  %v579_v6 = vld [vmem:[%s3279_s2 + $0x68] sm:$0xff] }
  0x99   :  { %v581_v8 = vld [vmem:[%s3279_s2 + $0x78] sm:$0xff] }
  0x9a   :  { %1401 = vmatpush1.bf16.msra.mxu0 %v1400_v19  ;;  %v750_v19 = vld [vmem:[%s3279_s2 + $0x5c0] sm:$0xff]  ;;  %v629_v47 = vld [vmem:[%s3279_s2 + $0x1f8] sm:$0xff] }
  0x9b   :  { %1465 = vmatpush1.bf16.msra.mxu1 %v1464_v20  ;;  %1403 = vmatprep.subr.bf16.mxu0 %v1402_v21  ;;  %v744_v20 = vld [vmem:[%s3279_s2 + $0x590] sm:$0xff]  ;;  %v1486_v21 = vpack.c.bf16 %v753_v12, %v745_v11  ;;  %v1424_v27 = vpack.c.bf16 %v750_v19, %v742_v18  ;;  %v1506_v11 = vpack.c.bf16 %v579_v6, %v571_v5  ;;  %v570_v12 = vld [vmem:[%s3279_s2 + $0x20] sm:$0xff]  ;;  %v587_v19 = vld [vmem:[%s3279_s2 + $0xa8] sm:$0xff] }
  0x9c   :  { %1467 = vmatprep.subr.bf16.mxu1 %v1466_v25  ;;  %v761_v25 = vld [vmem:[%s3279_s2 + $0x618] sm:$0xff]  ;;  %v1488_v28 = vpack.c.bf16 %v752_v22, %v744_v20  ;;  %v580_v18 = vld [vmem:[%s3279_s2 + $0x70] sm:$0xff]  ;;  %v595_v20 = vld [vmem:[%s3279_s2 + $0xe8] sm:$0xff] }
  0x9d   :  { %v597_v22 = vld [vmem:[%s3279_s2 + $0xf8] sm:$0xff] }
  0x9e   :  { %1405 = vmatpush1.bf16.msra.mxu0 %v1404_v31  ;;  %v766_v31 = vld [vmem:[%s3279_s2 + $0x640] sm:$0xff]  ;;  %v637_v57 = vld [vmem:[%s3279_s2 + $0x238] sm:$0xff] }
  0x9f   :  { %1469 = vmatpush1.bf16.msra.mxu1 %v1468_v32  ;;  %1407 = vmatprep.subr.bf16.mxu0 %v1406_v33  ;;  %v760_v32 = vld [vmem:[%s3279_s2 + $0x610] sm:$0xff]  ;;  %v1490_v33 = vpack.c.bf16 %v769_v26, %v761_v25  ;;  %v1428_v39 = vpack.c.bf16 %v766_v31, %v758_v30  ;;  %v1510_v25 = vpack.c.bf16 %v595_v20, %v587_v19  ;;  %v586_v26 = vld [vmem:[%s3279_s2 + $0xa0] sm:$0xff]  ;;  %v603_v31 = vld [vmem:[%s3279_s2 + $0x128] sm:$0xff] }
  0xa0   :  { %1471 = vmatprep.subr.bf16.mxu1 %v1470_v37  ;;  %v777_v37 = vld [vmem:[%s3279_s2 + $0x698] sm:$0xff]  ;;  %v1492_v40 = vpack.c.bf16 %v768_v34, %v760_v32  ;;  %v596_v30 = vld [vmem:[%s3279_s2 + $0xf0] sm:$0xff]  ;;  %v611_v32 = vld [vmem:[%s3279_s2 + $0x168] sm:$0xff] }
  0xa1   :  { %v605_v34 = vld [vmem:[%s3279_s2 + $0x138] sm:$0xff] }
  0xa2   :  { %1409 = vmatpush1.bf16.msra.mxu0 %v1408_v42  ;;  %v782_v42 = vld [vmem:[%s3279_s2 + $0x6c0] sm:$0xff]  ;;  %v645_v58 = vld [vmem:[%s3279_s2 + $0x278] sm:$0xff] }
  0xa3   :  { %1473 = vmatpush1.bf16.msra.mxu1 %v1472_v43  ;;  %1411 = vmatprep.subr.bf16.mxu0 %v1410_v44  ;;  %v776_v43 = vld [vmem:[%s3279_s2 + $0x690] sm:$0xff]  ;;  %v1494_v44 = vpack.c.bf16 %v785_v38, %v777_v37  ;;  %v1432_v50 = vpack.c.bf16 %v782_v42, %v774_v41  ;;  %v1514_v38 = vpack.c.bf16 %v611_v32, %v603_v31  ;;  %v653_v5 = vld [vmem:[%s3279_s2 + $0x2b8] sm:$0xff] }
  0xa4   :  { %1475 = vmatprep.subr.bf16.mxu1 %v1474_v48  ;;  %v793_v48 = vld [vmem:[%s3279_s2 + $0x718] sm:$0xff]  ;;  %v1496_v51 = vpack.c.bf16 %v784_v45, %v776_v43  ;;  %v1578_v41 = vpack.c.bf16 %v613_v35, %v605_v34  ;;  %v612_v42 = vld [vmem:[%s3279_s2 + $0x170] sm:$0xff]  ;;  %v619_v43 = vld [vmem:[%s3279_s2 + $0x1a8] sm:$0xff] }
  0xa5   :  { %v1635_v45 = vld [vmem:[%s3278_s0 + $0x8] sm:$0xff]  ;;  %v661_v6 = vld [vmem:[%s3279_s2 + $0x2f8] sm:$0xff] }
  0xa6   :  { %1413 = vmatpush1.bf16.msra.mxu0 %v1412_v53  ;;  %v798_v53 = vld [vmem:[%s3279_s2 + $0x740] sm:$0xff]  ;;  %v669_v19 = vld [vmem:[%s3279_s2 + $0x338] sm:$0xff] }
  0xa7   :  { %1477 = vmatpush1.bf16.msra.mxu1 %v1476_v54  ;;  %1415 = vmatprep.subr.bf16.mxu0 %v1414_v55  ;;  %v792_v54 = vld [vmem:[%s3279_s2 + $0x710] sm:$0xff]  ;;  %v1498_v55 = vpack.c.bf16 %v801_v49, %v793_v48  ;;  %v1436_v61 = vpack.c.bf16 %v798_v53, %v790_v52  ;;  %v1582_v53 = vpack.c.bf16 %v629_v47, %v621_v46  ;;  %v677_v20 = vld [vmem:[%s3279_s2 + $0x378] sm:$0xff] }
  0xa8   :  { %1479 = vmatprep.subr.bf16.mxu1 %v1478_v59  ;;  %v809_v59 = vld [vmem:[%s3279_s2 + $0x798] sm:$0xff]  ;;  %v1500_v62 = vpack.c.bf16 %v800_v56, %v792_v54  ;;  %v620_v52 = vld [vmem:[%s3279_s2 + $0x1b0] sm:$0xff]  ;;  %v643_v56 = vld [vmem:[%s3279_s2 + $0x268] sm:$0xff] }
  0xa9   :  { %v628_v54 = vld [vmem:[%s3279_s2 + $0x1f0] sm:$0xff]  ;;  %v685_v31 = vld [vmem:[%s3279_s2 + $0x3b8] sm:$0xff] }
  0xaa   :  { %1417 = vmatpush1.bf16.msra.mxu0 %v1416_v1  ;;  %v814_v1 = vld [vmem:[%s3279_s2 + $0x7c0] sm:$0xff]  ;;  %v693_v32 = vld [vmem:[%s3279_s2 + $0x3f8] sm:$0xff] }
  0xab   :  { %1481 = vmatpush1.bf16.msra.mxu1 %v1480_v2  ;;  %1419 = vmatprep.subr.bf16.mxu0 %v1418_v3  ;;  %v808_v2 = vld [vmem:[%s3279_s2 + $0x790] sm:$0xff]  ;;  %v1502_v3 = vpack.c.bf16 %v817_v60, %v809_v59  ;;  %v1440_v9 = vpack.c.bf16 %v814_v1, %v806_v0  ;;  %v1584_v60 = vpack.c.bf16 %v628_v54, %v620_v52  ;;  %v715_v52 = vld [vmem:[%s3279_s2 + $0x4a8] sm:$0xff]  ;;  %v717_v54 = vld [vmem:[%s3279_s2 + $0x4b8] sm:$0xff] }
  0xac   :  { %1483 = vmatprep.subr.bf16.mxu1 %v1482_v7  ;;  %v573_v7 = vld [vmem:[%s3279_s2 + $0x38] sm:$0xff]  ;;  %v1504_v10 = vpack.c.bf16 %v816_v4, %v808_v2  ;;  %v636_v0 = vld [vmem:[%s3279_s2 + $0x230] sm:$0xff]  ;;  %v1586_v1 = vpack.c.bf16 %v645_v58, %v637_v57  ;;  %v659_v4 = vld [vmem:[%s3279_s2 + $0x2e8] sm:$0xff] }
  0xad   :  { %v644_v2 = vld [vmem:[%s3279_s2 + $0x270] sm:$0xff] }
  0xae   :  { %1421 = vmatpush1.bf16.msra.mxu0 %v1420_v13  ;;  %v578_v13 = vld [vmem:[%s3279_s2 + $0x60] sm:$0xff] }
  0xaf   :  { %1485 = vmatpush1.bf16.msra.mxu1 %v1484_v14  ;;  %1423 = vmatprep.subr.bf16.mxu0 %v1422_v17  ;;  %v572_v14 = vld [vmem:[%s3279_s2 + $0x30] sm:$0xff]  ;;  %v1570_v17 = vpack.c.bf16 %v581_v8, %v573_v7  ;;  %v1508_v23 = vpack.c.bf16 %v578_v13, %v570_v12  ;;  %v1588_v8 = vpack.c.bf16 %v644_v2, %v636_v0  ;;  %v731_v0 = vld [vmem:[%s3279_s2 + $0x528] sm:$0xff]  ;;  %v733_v2 = vld [vmem:[%s3279_s2 + $0x538] sm:$0xff] }
  0xb0   :  { %1487 = vmatprep.subr.bf16.mxu1 %v1486_v21  ;;  %v589_v21 = vld [vmem:[%s3279_s2 + $0xb8] sm:$0xff]  ;;  %v1572_v24 = vpack.c.bf16 %v580_v18, %v572_v14  ;;  %v652_v12 = vld [vmem:[%s3279_s2 + $0x2b0] sm:$0xff]  ;;  %v1590_v13 = vpack.c.bf16 %v661_v6, %v653_v5  ;;  %v675_v18 = vld [vmem:[%s3279_s2 + $0x368] sm:$0xff] }
  0xb1   :  { %v660_v14 = vld [vmem:[%s3279_s2 + $0x2f0] sm:$0xff] }
  0xb2   :  { %1425 = vmatpush1.bf16.msra.mxu0 %v1424_v27  ;;  %v594_v27 = vld [vmem:[%s3279_s2 + $0xe0] sm:$0xff] }
  0xb3   :  { %1489 = vmatpush1.bf16.msra.mxu1 %v1488_v28  ;;  %1427 = vmatprep.subr.bf16.mxu0 %v1426_v29  ;;  %v588_v28 = vld [vmem:[%s3279_s2 + $0xb0] sm:$0xff]  ;;  %v1574_v29 = vpack.c.bf16 %v597_v22, %v589_v21  ;;  %v1512_v36 = vpack.c.bf16 %v594_v27, %v586_v26  ;;  %v1592_v22 = vpack.c.bf16 %v660_v14, %v652_v12  ;;  %v747_v12 = vld [vmem:[%s3279_s2 + $0x5a8] sm:$0xff]  ;;  %v749_v14 = vld [vmem:[%s3279_s2 + $0x5b8] sm:$0xff] }
  0xb4   :  { %1491 = vmatprep.subr.bf16.mxu1 %v1490_v33  ;;  %v2890_v33 = vld [vmem:[%s3278_s0] sm:$0xff]  ;;  %v1576_v37 = vpack.c.bf16 %v596_v30, %v588_v28  ;;  %v668_v26 = vld [vmem:[%s3279_s2 + $0x330] sm:$0xff]  ;;  %v1594_v27 = vpack.c.bf16 %v677_v20, %v669_v19  ;;  %v691_v30 = vld [vmem:[%s3279_s2 + $0x3e8] sm:$0xff] }
  0xb5   :  { %v676_v28 = vld [vmem:[%s3279_s2 + $0x370] sm:$0xff] }
  0xb6   :  { %1429 = vmatpush1.bf16.msra.mxu0 %v1428_v39  ;;  %v602_v39 = vld [vmem:[%s3279_s2 + $0x120] sm:$0xff]  ;;  %v1596_v35 = vpack.c.bf16 %v676_v28, %v668_v26  ;;  %v763_v26 = vld [vmem:[%s3279_s2 + $0x628] sm:$0xff]  ;;  %v765_v28 = vld [vmem:[%s3279_s2 + $0x638] sm:$0xff] }
  0xb7   :  { %1493 = vmatpush1.bf16.msra.mxu1 %v1492_v40  ;;  %1431 = vmatprep.subr.bf16.mxu0 %v1430_v15  ;;  %v610_v40 = vld [vmem:[%s3279_s2 + $0x160] sm:$0xff]  ;;  %v604_v15 = vld [vmem:[%s3279_s2 + $0x130] sm:$0xff] }
  0xb8   :  { %1495 = vmatprep.subr.bf16.mxu1 %v1494_v44  ;;  %v627_v44 = vld [vmem:[%s3279_s2 + $0x1e8] sm:$0xff]  ;;  %v1516_v48 = vpack.c.bf16 %v610_v40, %v602_v39  ;;  %v1580_v49 = vpack.c.bf16 %v612_v42, %v604_v15  ;;  %v684_v39 = vld [vmem:[%s3279_s2 + $0x3b0] sm:$0xff]  ;;  %v1598_v40 = vpack.c.bf16 %v693_v32, %v685_v31 }
  0xb9   :  { %v692_v15 = vld [vmem:[%s3279_s2 + $0x3f0] sm:$0xff]  ;;  %v707_v42 = vld [vmem:[%s3279_s2 + $0x468] sm:$0xff] }
  0xba   :  { %1433 = vmatpush1.bf16.msra.mxu0 %v1432_v50  ;;  %v1518_v50 = vpack.c.bf16 %v627_v44, %v619_v43  ;;  %v701_v43 = vld [vmem:[%s3279_s2 + $0x438] sm:$0xff]  ;;  %v1600_v46 = vpack.c.bf16 %v692_v15, %v684_v39  ;;  %v779_v39 = vld [vmem:[%s3279_s2 + $0x6a8] sm:$0xff] }
  0xbb   :  { %1497 = vmatpush1.bf16.msra.mxu1 %v1496_v51  ;;  %1435 = vmatprep.subr.bf16.mxu0 %v1434_v16  ;;  %v618_v51 = vld [vmem:[%s3279_s2 + $0x1a0] sm:$0xff]  ;;  %v709_v44 = vld [vmem:[%s3279_s2 + $0x478] sm:$0xff] }
  0xbc   :  { %1499 = vmatprep.subr.bf16.mxu1 %v1498_v55  ;;  %v626_v16 = vld [vmem:[%s3279_s2 + $0x1e0] sm:$0xff]  ;;  %v635_v55 = vld [vmem:[%s3279_s2 + $0x228] sm:$0xff]  ;;  %v781_v15 = vld [vmem:[%s3279_s2 + $0x6b8] sm:$0xff] }
  0xbd   :  { %v1520_v59 = vpack.c.bf16 %v626_v16, %v618_v51  ;;  %v1602_v51 = vpack.c.bf16 %v709_v44, %v701_v43  ;;  %v708_v16 = vld [vmem:[%s3279_s2 + $0x470] sm:$0xff] }
  0xbe   :  { %1437 = vmatpush1.bf16.msra.mxu0 %v1436_v61  ;;  %v1522_v61 = vpack.c.bf16 %v643_v56, %v635_v55  ;;  %v725_v55 = vld [vmem:[%s3279_s2 + $0x4f8] sm:$0xff] }
  0xbf   :  { %1501 = vmatpush1.bf16.msra.mxu1 %v1500_v62  ;;  %1439 = vmatprep.subr.bf16.mxu0 %v1438_v63  ;;  %v634_v62 = vld [vmem:[%s3279_s2 + $0x220] sm:$0xff] }
  0xc0   :  { %1503 = vmatprep.subr.bf16.mxu1 %v1502_v3  ;;  %v642_v63 = vld [vmem:[%s3279_s2 + $0x260] sm:$0xff]  ;;  %v651_v3 = vld [vmem:[%s3279_s2 + $0x2a8] sm:$0xff] }
  0xc1   :  { %v1524_v7 = vpack.c.bf16 %v642_v63, %v634_v62  ;;  %v1606_v62 = vpack.c.bf16 %v725_v55, %v717_v54  ;;  %v724_v63 = vld [vmem:[%s3279_s2 + $0x4f0] sm:$0xff] }
  0xc2   :  { %1441 = vmatpush1.bf16.msra.mxu0 %v1440_v9  ;;  %v1526_v9 = vpack.c.bf16 %v659_v4, %v651_v3  ;;  %v741_v3 = vld [vmem:[%s3279_s2 + $0x578] sm:$0xff] }
  0xc3   :  { %1505 = vmatpush1.bf16.msra.mxu1 %v1504_v10  ;;  %1507 = vmatprep.subr.bf16.mxu0 %v1506_v11  ;;  %v650_v10 = vld [vmem:[%s3279_s2 + $0x2a0] sm:$0xff] }
  0xc4   :  { %1571 = vmatprep.subr.bf16.mxu1 %v1570_v17  ;;  %v658_v11 = vld [vmem:[%s3279_s2 + $0x2e0] sm:$0xff]  ;;  %v667_v17 = vld [vmem:[%s3279_s2 + $0x328] sm:$0xff] }
  0xc5   :  { %887 = vmatmul.mubr.f32.vlgmr.msra.gmra.mrb[4].mxu0 %v2890_v33  ;;  %v1528_v21 = vpack.c.bf16 %v658_v11, %v650_v10  ;;  %v1610_v10 = vpack.c.bf16 %v741_v3, %v733_v2  ;;  %v740_v11 = vld [vmem:[%s3279_s2 + $0x570] sm:$0xff] }
  0xc6   :  { %958 = vmatmul.mubr.f32.vlgmr.msra.gmra.mrb[4].mxu1 %v2890_v33  ;;  %1509 = vmatpush1.bf16.msra.mxu0 %v1508_v23  ;;  %v1530_v23 = vpack.c.bf16 %v675_v18, %v667_v17  ;;  %v757_v17 = vld [vmem:[%s3279_s2 + $0x5f8] sm:$0xff] }
  0xc7   :  { %1573 = vmatpush1.bf16.msra.mxu1 %v1572_v24  ;;  %1511 = vmatprep.subr.bf16.mxu0 %v1510_v25  ;;  %v666_v24 = vld [vmem:[%s3279_s2 + $0x320] sm:$0xff] }
  0xc8   :  { %1575 = vmatprep.subr.bf16.mxu1 %v1574_v29  ;;  %1028 = vmatprep.mubr.f32.mxu0 %v1635_v45  ;;  %v674_v25 = vld [vmem:[%s3279_s2 + $0x360] sm:$0xff]  ;;  %v683_v29 = vld [vmem:[%s3279_s2 + $0x3a8] sm:$0xff] }
  0xc9   :  { %1099 = vmatprep.mubr.f32.mxu1 %v1635_v45  ;;  %v1532_v34 = vpack.c.bf16 %v674_v25, %v666_v24  ;;  %v1614_v24 = vpack.c.bf16 %v757_v17, %v749_v14  ;;  %v756_v25 = vld [vmem:[%s3279_s2 + $0x5f0] sm:$0xff] }
  0xca   :  { %1513 = vmatpush1.bf16.msra.mxu0 %v1512_v36  ;;  %v1534_v36 = vpack.c.bf16 %v691_v30, %v683_v29  ;;  %v773_v29 = vld [vmem:[%s3279_s2 + $0x678] sm:$0xff] }
  0xcb   :  { %1577 = vmatpush1.bf16.msra.mxu1 %v1576_v37  ;;  %1515 = vmatprep.subr.bf16.mxu0 %v1514_v38  ;;  %v682_v37 = vld [vmem:[%s3279_s2 + $0x3a0] sm:$0xff] }
  0xcc   :  { %1579 = vmatprep.subr.bf16.mxu1 %v1578_v41  ;;  %v690_v38 = vld [vmem:[%s3279_s2 + $0x3e0] sm:$0xff]  ;;  %v699_v41 = vld [vmem:[%s3279_s2 + $0x428] sm:$0xff] }
  0xcd   :  { %v1536_v45 = vpack.c.bf16 %v690_v38, %v682_v37  ;;  %v1538_v47 = vpack.c.bf16 %v707_v42, %v699_v41  ;;  %v1618_v37 = vpack.c.bf16 %v773_v29, %v765_v28  ;;  %v772_v38 = vld [vmem:[%s3279_s2 + $0x670] sm:$0xff]  ;;  %v789_v41 = vld [vmem:[%s3279_s2 + $0x6f8] sm:$0xff] }
  0xce   :  { %1517 = vmatpush1.bf16.msra.mxu0 %v1516_v48  ;;  %v698_v48 = vld [vmem:[%s3279_s2 + $0x420] sm:$0xff] }
  0xcf   :  { %1581 = vmatpush1.bf16.msra.mxu1 %v1580_v49  ;;  %1519 = vmatprep.subr.bf16.mxu0 %v1518_v50  ;;  %v706_v49 = vld [vmem:[%s3279_s2 + $0x460] sm:$0xff]  ;;  %v700_v50 = vld [vmem:[%s3279_s2 + $0x430] sm:$0xff] }
  0xd0   :  { %1583 = vmatprep.subr.bf16.mxu1 %v1582_v53  ;;  %v723_v53 = vld [vmem:[%s3279_s2 + $0x4e8] sm:$0xff]  ;;  %v1540_v56 = vpack.c.bf16 %v706_v49, %v698_v48  ;;  %v1604_v57 = vpack.c.bf16 %v708_v16, %v700_v50  ;;  %v1622_v48 = vpack.c.bf16 %v789_v41, %v781_v15  ;;  %v788_v49 = vld [vmem:[%s3279_s2 + $0x6f0] sm:$0xff]  ;;  %v797_v16 = vld [vmem:[%s3279_s2 + $0x738] sm:$0xff] }
  0xd1   :  { %v1542_v58 = vpack.c.bf16 %v723_v53, %v715_v52  ;;  %v795_v50 = vld [vmem:[%s3279_s2 + $0x728] sm:$0xff]  ;;  %v805_v52 = vld [vmem:[%s3279_s2 + $0x778] sm:$0xff] }
  0xd2   :  { %1521 = vmatpush1.bf16.msra.mxu0 %v1520_v59  ;;  %v714_v59 = vld [vmem:[%s3279_s2 + $0x4a0] sm:$0xff] }
  0xd3   :  { %1585 = vmatpush1.bf16.msra.mxu1 %v1584_v60  ;;  %1523 = vmatprep.subr.bf16.mxu0 %v1522_v61  ;;  %v722_v60 = vld [vmem:[%s3279_s2 + $0x4e0] sm:$0xff]  ;;  %v716_v61 = vld [vmem:[%s3279_s2 + $0x4b0] sm:$0xff] }
  0xd4   :  { %1587 = vmatprep.subr.bf16.mxu1 %v1586_v1  ;;  %v739_v1 = vld [vmem:[%s3279_s2 + $0x568] sm:$0xff]  ;;  %v1544_v4 = vpack.c.bf16 %v722_v60, %v714_v59  ;;  %v1608_v5 = vpack.c.bf16 %v724_v63, %v716_v61  ;;  %v1626_v59 = vpack.c.bf16 %v805_v52, %v797_v16  ;;  %v804_v60 = vld [vmem:[%s3279_s2 + $0x770] sm:$0xff]  ;;  %v813_v63 = vld [vmem:[%s3279_s2 + $0x7b8] sm:$0xff] }
  0xd5   :  { %v1546_v6 = vpack.c.bf16 %v739_v1, %v731_v0  ;;  %v811_v61 = vld [vmem:[%s3279_s2 + $0x7a8] sm:$0xff]  ;;  %v821_v0 = vld [vmem:[%s3279_s2 + $0x7f8] sm:$0xff] }
  0xd6   :  { %1525 = vmatpush1.bf16.msra.mxu0 %v1524_v7  ;;  %v730_v7 = vld [vmem:[%s3279_s2 + $0x520] sm:$0xff] }
  0xd7   :  { %1589 = vmatpush1.bf16.msra.mxu1 %v1588_v8  ;;  %1527 = vmatprep.subr.bf16.mxu0 %v1526_v9  ;;  %v738_v8 = vld [vmem:[%s3279_s2 + $0x560] sm:$0xff]  ;;  %v732_v9 = vld [vmem:[%s3279_s2 + $0x530] sm:$0xff] }
  0xd8   :  { %1591 = vmatprep.subr.bf16.mxu1 %v1590_v13  ;;  %v755_v13 = vld [vmem:[%s3279_s2 + $0x5e8] sm:$0xff]  ;;  %v1548_v18 = vpack.c.bf16 %v738_v8, %v730_v7  ;;  %v1612_v19 = vpack.c.bf16 %v740_v11, %v732_v9  ;;  %v812_v7 = vld [vmem:[%s3279_s2 + $0x7b0] sm:$0xff] }
  0xd9   :  { %v1550_v20 = vpack.c.bf16 %v755_v13, %v747_v12  ;;  %v820_v8 = vld [vmem:[%s3279_s2 + $0x7f0] sm:$0xff] }
  0xda   :  { %1529 = vmatpush1.bf16.msra.mxu0 %v1528_v21  ;;  %v746_v21 = vld [vmem:[%s3279_s2 + $0x5a0] sm:$0xff] }
  0xdb   :  { %1593 = vmatpush1.bf16.msra.mxu1 %v1592_v22  ;;  %1531 = vmatprep.subr.bf16.mxu0 %v1530_v23  ;;  %v754_v22 = vld [vmem:[%s3279_s2 + $0x5e0] sm:$0xff]  ;;  %v748_v23 = vld [vmem:[%s3279_s2 + $0x5b0] sm:$0xff] }
  0xdc   :  { %1595 = vmatprep.subr.bf16.mxu1 %v1594_v27  ;;  %v771_v27 = vld [vmem:[%s3279_s2 + $0x668] sm:$0xff]  ;;  %v1552_v30 = vpack.c.bf16 %v754_v22, %v746_v21  ;;  %v1616_v31 = vpack.c.bf16 %v756_v25, %v748_v23 }
  0xdd   :  { %v1554_v32 = vpack.c.bf16 %v771_v27, %v763_v26 }
  0xde   :  { %1533 = vmatpush1.bf16.msra.mxu0 %v1532_v34  ;;  %v762_v34 = vld [vmem:[%s3279_s2 + $0x620] sm:$0xff] }
  0xdf   :  { %1597 = vmatpush1.bf16.msra.mxu1 %v1596_v35  ;;  %1535 = vmatprep.subr.bf16.mxu0 %v1534_v36  ;;  %v770_v35 = vld [vmem:[%s3279_s2 + $0x660] sm:$0xff]  ;;  %v764_v36 = vld [vmem:[%s3279_s2 + $0x630] sm:$0xff] }
  0xe0   :  { %1599 = vmatprep.subr.bf16.mxu1 %v1598_v40  ;;  %v787_v40 = vld [vmem:[%s3279_s2 + $0x6e8] sm:$0xff]  ;;  %v1556_v42 = vpack.c.bf16 %v770_v35, %v762_v34  ;;  %v1620_v43 = vpack.c.bf16 %v772_v38, %v764_v36 }
  0xe1   :  { %v1558_v44 = vpack.c.bf16 %v787_v40, %v779_v39 }
  0xe2   :  { %1537 = vmatpush1.bf16.msra.mxu0 %v1536_v45  ;;  %v778_v45 = vld [vmem:[%s3279_s2 + $0x6a0] sm:$0xff] }
  0xe3   :  { %1601 = vmatpush1.bf16.msra.mxu1 %v1600_v46  ;;  %1539 = vmatprep.subr.bf16.mxu0 %v1538_v47  ;;  %v786_v46 = vld [vmem:[%s3279_s2 + $0x6e0] sm:$0xff]  ;;  %v780_v47 = vld [vmem:[%s3279_s2 + $0x6b0] sm:$0xff] }
  0xe4   :  { %1603 = vmatprep.subr.bf16.mxu1 %v1602_v51  ;;  %v803_v51 = vld [vmem:[%s3279_s2 + $0x768] sm:$0xff]  ;;  %v1560_v53 = vpack.c.bf16 %v786_v46, %v778_v45  ;;  %v1624_v54 = vpack.c.bf16 %v788_v49, %v780_v47 }
  0xe5   :  { %v1562_v55 = vpack.c.bf16 %v803_v51, %v795_v50 }
  0xe6   :  { %1541 = vmatpush1.bf16.msra.mxu0 %v1540_v56  ;;  %v794_v56 = vld [vmem:[%s3279_s2 + $0x720] sm:$0xff] }
  0xe7   :  { %1605 = vmatpush1.bf16.msra.mxu1 %v1604_v57  ;;  %1543 = vmatprep.subr.bf16.mxu0 %v1542_v58  ;;  %v802_v57 = vld [vmem:[%s3279_s2 + $0x760] sm:$0xff]  ;;  %v796_v58 = vld [vmem:[%s3279_s2 + $0x730] sm:$0xff] }
  0xe8   :  { %1607 = vmatprep.subr.bf16.mxu1 %v1606_v62  ;;  %v819_v62 = vld [vmem:[%s3279_s2 + $0x7e8] sm:$0xff]  ;;  %v1564_v1 = vpack.c.bf16 %v802_v57, %v794_v56  ;;  %v1628_v2 = vpack.c.bf16 %v804_v60, %v796_v58 }
  0xe9   :  { %v1566_v3 = vpack.c.bf16 %v819_v62, %v811_v61 }
  0xea   :  { %1545 = vmatpush1.bf16.msra.mxu0 %v1544_v4  ;;  %v810_v4 = vld [vmem:[%s3279_s2 + $0x7a0] sm:$0xff] }
  0xeb   :  { %1609 = vmatpush1.bf16.msra.mxu1 %v1608_v5  ;;  %1547 = vmatprep.subr.bf16.mxu0 %v1546_v6  ;;  %v818_v5 = vld [vmem:[%s3279_s2 + $0x7e0] sm:$0xff]  ;;  %v1630_v6 = vpack.c.bf16 %v821_v0, %v813_v63 }
  0xec   :  { %1611 = vmatprep.subr.bf16.mxu1 %v1610_v10  ;;  %v1568_v9 = vpack.c.bf16 %v818_v5, %v810_v4  ;;  %v1632_v10 = vpack.c.bf16 %v820_v8, %v812_v7 }
  0xee   :  { %1549 = vmatpush1.bf16.msra.mxu0 %v1548_v18 }
  0xef   :  { %1613 = vmatpush1.bf16.msra.mxu1 %v1612_v19  ;;  %1551 = vmatprep.subr.bf16.mxu0 %v1550_v20 }
  0xf0   :  { %1615 = vmatprep.subr.bf16.mxu1 %v1614_v24 }
  0xf2   :  { %1553 = vmatpush1.bf16.msra.mxu0 %v1552_v30 }
  0xf3   :  { %1617 = vmatpush1.bf16.msra.mxu1 %v1616_v31  ;;  %1555 = vmatprep.subr.bf16.mxu0 %v1554_v32 }
  0xf4   :  { %1619 = vmatprep.subr.bf16.mxu1 %v1618_v37 }
  0xf6   :  { %1557 = vmatpush1.bf16.msra.mxu0 %v1556_v42 }
  0xf7   :  { %1621 = vmatpush1.bf16.msra.mxu1 %v1620_v43  ;;  %1559 = vmatprep.subr.bf16.mxu0 %v1558_v44 }
  0xf8   :  { %1623 = vmatprep.subr.bf16.mxu1 %v1622_v48 }
  0xfa   :  { %1561 = vmatpush1.bf16.msra.mxu0 %v1560_v53 }
  0xfb   :  { %1625 = vmatpush1.bf16.msra.mxu1 %v1624_v54  ;;  %1563 = vmatprep.subr.bf16.mxu0 %v1562_v55 }
  0xfc   :  { %1627 = vmatprep.subr.bf16.mxu1 %v1626_v59 }
  0xfe   :  { %1565 = vmatpush1.bf16.msra.mxu0 %v1564_v1 }
  0xff   :  { %1629 = vmatpush1.bf16.msra.mxu1 %v1628_v2  ;;  %1567 = vmatprep.subr.bf16.mxu0 %v1566_v3 }
 0x100   :  { %1631 = vmatprep.subr.bf16.mxu1 %v1630_v6 }
 0x102   :  { %1569 = vmatpush1.bf16.msra.mxu0 %v1568_v9 }
 0x103   :  { %1633 = vmatpush1.bf16.msra.mxu1 %v1632_v10 }
 0x105   :  { %1029 = vmatmul.mubr.f32.vlgmr.msra.gmra.mrb[6].mxu0 %v2890_v33 }
 0x106   :  { %1100 = vmatmul.mubr.f32.vlgmr.msra.gmra.mrb[6].mxu1 %v2890_v33 }
 0x118   :  { %v340_v11 = vpop.f32.mrb[0].mxu0 }
 0x119   :  { %558 = vst [vmem:[%s3280_s3] sm:$0xff] %v340_v11  ;;  %v411_v12 = vpop.f32.mrb[0].mxu1  ;;  %v342_v13 = vpop.f32.mrb[1].mxu0 }
 0x11a   :  { %560 = vst [vmem:[%s3280_s3 + $0x10] sm:$0xff] %v411_v12  ;;  %559 = vst [vmem:[%s3280_s3 + $0x8] sm:$0xff] %v342_v13  ;;  %v413_v14 = vpop.f32.mrb[1].mxu1 }
 0x11b   :  { %561 = vst [vmem:[%s3280_s3 + $0x18] sm:$0xff] %v413_v14 }
 0x158   :  { %v482_v33 = vpop.f32.mrb[2].mxu0 }
 0x159   :  { %562 = vst [vmem:[%s3280_s3 + $0x20] sm:$0xff] %v482_v33  ;;  %v553_v17 = vpop.f32.mrb[2].mxu1  ;;  %v484_v18 = vpop.f32.mrb[3].mxu0 }
 0x15a   :  { %564 = vst [vmem:[%s3280_s3 + $0x30] sm:$0xff] %v553_v17  ;;  %563 = vst [vmem:[%s3280_s3 + $0x28] sm:$0xff] %v484_v18  ;;  %v555_v19 = vpop.f32.mrb[3].mxu1 }
 0x15b   :  { %565 = vst [vmem:[%s3280_s3 + $0x38] sm:$0xff] %v555_v19 }
 0x198   :  { %v888_v20 = vpop.f32.mrb[4].mxu0 }
 0x199   :  { %1106 = vst [vmem:[%s3281_s4] sm:$0xff] %v888_v20  ;;  %v959_v21 = vpop.f32.mrb[4].mxu1  ;;  %v890_v22 = vpop.f32.mrb[5].mxu0 }
 0x19a   :  { %1108 = vst [vmem:[%s3281_s4 + $0x10] sm:$0xff] %v959_v21  ;;  %1107 = vst [vmem:[%s3281_s4 + $0x8] sm:$0xff] %v890_v22  ;;  %v961_v23 = vpop.f32.mrb[5].mxu1 }
 0x19b   :  { %1109 = vst [vmem:[%s3281_s4 + $0x18] sm:$0xff] %v961_v23 }
 0x1d8   :  { %v1030_v24 = vpop.f32.mrb[6].mxu0 }
 0x1d9   :  { %1110 = vst [vmem:[%s3281_s4 + $0x20] sm:$0xff] %v1030_v24  ;;  %v1101_v25 = vpop.f32.mrb[6].mxu1  ;;  %v1032_v26 = vpop.f32.mrb[7].mxu0 }
 0x1da   :  { %1112 = vst [vmem:[%s3281_s4 + $0x30] sm:$0xff] %v1101_v25  ;;  %1111 = vst [vmem:[%s3281_s4 + $0x28] sm:$0xff] %v1032_v26  ;;  %v1103_v27 = vpop.f32.mrb[7].mxu1 }
 0x1db   :  { %1113 = vst [vmem:[%s3281_s4 + $0x38] sm:$0xff] %v1103_v27 }

// kernel: custom-call
= control target key start
LH: loop header
LB: loop body
LE: loop exit
PB: predicated region body
PF: predicated region fallthrough
CT: control target
= control target key end

     0   :  { %s126_s0 = inlined_call_operand.vmem [shape: f32[2,4,4,16,16], index: 0, kind: input, shape index: {}]   ;;  %s127_s1 = inlined_call_operand.vmem [shape: f32[2,4,4,16,16], index: 1, kind: input, shape index: {}]   ;;  %s128_s2 = inlined_call_operand.hbm [shape: c64[2,4,4,16,16], index: 2, kind: output, shape index: {}]  }
   0x1   :  { %s87_s11 = scalar_lea.hbm %s128_s2, 8192 }
   0x2   :  { %4 = vsyncpa [#allocation0], 0  ;;  %s5_s14 = sshll.u32 %s126_s0, 4  ;;  %s6_s14 = int_to_ptr.vmem [resolvable:$true] %s5_s14 }
   0x3   :  { %s18_s15 = scalar_lea.vmem %s6_s14, 8192  ;;  %p23_p1 = scmp.lt.s32.totalorder %s6_s14, %s6_s14 }
   0x4   :  { %p19_p0 = scmp.ne.s32.totalorder %s6_s14, %s18_s15  ;;  %p24_p2 = scmp.lt.s32.totalorder %s18_s15, %s18_s15 }
   0x6   :  { %p25_p3 = por %p24_p2, %p23_p1 }
   0x8   :  { %p26_p4 = pnand %p25_p3, %p19_p0 }
   0xa   :  { %29 = shalt.err (!%p26_p4)  }
   0xb   :  { %p31_p5 = scmp.ne.s32.totalorder %s128_s2, %s87_s11  ;;  %s32_s0 = scalar_lea.hbm %s128_s2, 16384 }
   0xc   :  { %p33_p6 = scmp.lt.u32.totalorder %s32_s0, %s87_s11  ;;  %p34_p7 = scmp.lt.u32.totalorder %s87_s11, %s128_s2 }
   0xe   :  { %p35_p8 = por %p34_p7, %p33_p6 }
  0x10   :  { %p36_p9 = pnand %p35_p8, %p31_p5 }
  0x12   :  { %39 = shalt.err (!%p36_p9)  }
  0x13   :  { %8 = dma.vmem_to_hbm [thread:$0]  %s6_s14, 8192, %s128_s2, [#allocation0] }
  0x14   :  { %65 = dma.done.wait [#allocation0], 8192  }
  0x15   :  { %66 = vsyncadd [#allocation0], 4294959104 }
  0x16   :  { %10 = vsyncpa [#allocation0], 1 }
  0x17   :  { %11 = vsyncpa [#allocation1], 0  ;;  %s12_s28 = sshll.u32 %s127_s1, 4  ;;  %s13_s28 = int_to_ptr.vmem [resolvable:$true] %s12_s28 }
  0x18   :  { %s40_s29 = scalar_lea.vmem %s13_s28, 8192  ;;  %p45_p11 = scmp.lt.s32.totalorder %s13_s28, %s13_s28 }
  0x19   :  { %p41_p10 = scmp.ne.s32.totalorder %s13_s28, %s40_s29  ;;  %p46_p12 = scmp.lt.s32.totalorder %s40_s29, %s40_s29 }
  0x1b   :  { %p47_p13 = por %p46_p12, %p45_p11 }
  0x1d   :  { %p48_p0 = pnand %p47_p13, %p41_p10 }
  0x1f   :  { %51 = shalt.err (!%p48_p0)  }
  0x20   :  { %p53_p1 = scmp.ne.s32.totalorder %s87_s11, %s32_s0  ;;  %p56_p2 = scmp.lt.u32.totalorder %s32_s0, %s32_s0 }
  0x22   :  { %p57_p3 = por %p56_p2, %p34_p7 }
  0x24   :  { %p59_p4 = por %p57_p3, %p33_p6 }
  0x26   :  { %p60_p5 = pnand %p59_p4, %p53_p1 }
  0x28   :  { %63 = shalt.err (!%p60_p5)  }
  0x29   :  { %15 = dma.vmem_to_hbm [thread:$0]  %s13_s28, 8192, %s87_s11, [#allocation1] }
  0x2a   :  { %67 = dma.done.wait [#allocation1], 8192  }
  0x2b   :  { %68 = vsyncadd [#allocation1], 4294959104 }
  0x2c   :  { %17 = vsyncpa [#allocation1], 1 }

</bundles_post_ra>
